<compile_context>
chip_gen: v7x
topology: tpu7x:2x2x1
jax: 0.10.0
libtpu: 0.0.40
codegen_flags: <defaults>
</compile_context>

<pallas_src>
import functools
import random

import numpy as np
import jax
import jax.numpy as jnp
from jax.experimental import pallas as pl
from jax.experimental.pallas import tpu as pltpu


# ----------------------------- parameter setup (host glue) -----------------------------

def hz_to_mel(f):
    return 2595 * np.log10(1 + f / 700)


def mel_to_hz(m):
    return 700 * (10 ** (m / 2595) - 1)


def mel_frequencies(n_mels, fmin, fmax):
    low = hz_to_mel(fmin)
    high = hz_to_mel(fmax)
    mels = np.linspace(low, high, n_mels)
    return mel_to_hz(mels)


def hamming_window(n):
    # matches torch.hamming_window(n, periodic=False): alpha=0.54, beta=0.46
    k = np.arange(n, dtype=np.float64)
    return (0.54 - 0.46 * np.cos(2.0 * np.pi * k / (n - 1))).astype(np.float32)


def make_lowpass_filters(cutoffs):
    """Replicates LowPassFilters.__init__: returns (len(cutoffs), 2*width+1), width."""
    width = int(2 / min(cutoffs))
    ksize = 2 * width + 1
    window = hamming_window(ksize)
    t = np.arange(-width, width + 1, dtype=np.float32)
    filts = []
    for c in cutoffs:
        sinc = np.sinc(2 * c * t).astype(np.float32)
        filts.append((2 * c * sinc * window).astype(np.float32))
    return np.stack(filts), width


def banded_delta_matrix(filt, sub_t, halo, width):
    """Cross-correlation (F.conv1d, zero padding) of one output sub-block as a matmul.

    LHS row u of a sub-block holds window[u] = x[block_start - halo + u]; the output is
      out[t] = sum_k x[out_start + t - width + k] * filt[k]
    so W[u, t] = filt[u - t - (halo - width)] on the band |u - t - halo| <= width, else 0.
    """
    ksize = filt.shape[0]                     # 2*width + 1
    sub_win = sub_t + 2 * halo
    w = np.zeros((sub_win, sub_t), dtype=np.float32)
    off = halo - width
    for t in range(sub_t):
        w[t + off: t + off + ksize, t] = filt
    return w


# --------------------------------- Pallas kernel ----------------------------------

def bandmask_kernel(lhalo_ref, wav_ref, rhalo_ref, w_ref, o_ref, *, n_stack, sub_t, halo):
    j = pl.program_id(0)
    nb = pl.num_programs(0)
    cd = w_ref.dtype

    # Halo reads that fall outside [0, T) must act as the conv's zero padding: the left halo
    # is entirely out of range at j == 0, the right halo at j == nb-1 (multiplicative mask).
    keep_l = (j > 0).astype(jnp.float32)
    keep_r = (j < nb - 1).astype(jnp.float32)
    lhalo = (lhalo_ref[...] * keep_l).astype(cd)                      # (N, halo)
    rhalo = (rhalo_ref[...] * keep_r).astype(cd)                      # (N, halo)

    wav_c = wav_ref[...]                                              # (N, t_block) exact f32 carrier
    window = jnp.concatenate([lhalo, wav_c.astype(cd), rhalo], axis=1)  # (N, t_block + 2*halo)

    # Stack n_stack time sub-blocks as extra LHS rows so the MXU M dimension is filled even
    # when N = B*C is small; row block i holds window[:, i*sub_t : i*sub_t + sub_win].
    sub_win = sub_t + 2 * halo
    lhs = jnp.concatenate(
        [window[:, i * sub_t: i * sub_t + sub_win] for i in range(n_stack)], axis=0)

    # Fused (low - midlow) band-limited response: one banded matmul, f32 accumulation.
    delta = jnp.dot(lhs, w_ref[...], preferred_element_type=jnp.float32)  # (n_stack*N, sub_t)

    n = wav_ref.shape[0]
    for i in range(n_stack):
        sl = slice(i * sub_t, (i + 1) * sub_t)
        # BandMask.forward: wav - midlow + low == wav + delta (carrier stays exact f32).
        o_ref[:, sl] = wav_c[:, sl] + delta[i * n:(i + 1) * n, :]


# --------------------------------- wrapper ----------------------------------

def band_mask(wav, *, maxwidth=0.2, bands=120, sample_rate=16000, seed=0,
              t_block=1024, compute_dtype=jnp.bfloat16):
    wav = jnp.asarray(wav, dtype=jnp.float32)
    B, C, T = wav.shape
    N = B * C
    t_block = min(int(t_block), T)
    # TODO(synk): ragged last block (pl.when masking / pl.BoundedSlice) for arbitrary T.
    assert t_block % 128 == 0 and T % t_block == 0, \
        "T must be a multiple of the 128-aligned time block"

    bandwidth = int(abs(maxwidth) * bands)
    mels = mel_frequencies(bands, 40, sample_rate / 2) / sample_rate

    # TODO(synk): band selection stays host-side seeded Python RNG because the drawn band sets
    # the filter width and hence every kernel shape (one recompile per distinct width).
    rng = random.Random(seed)
    low_idx = rng.randrange(bands)
    high_cap = min(bands, low_idx + bandwidth)
    high_idx = rng.randrange(low_idx, high_cap) if high_cap > low_idx else low_idx

    filters, width = make_lowpass_filters([float(mels[low_idx]), float(mels[high_idx])])
    aux = dict(filters=filters, width=width, low_idx=low_idx, high_idx=high_idx)

    if low_idx == high_idx:
        # Degenerate draw: low == midlow  =>  wav - midlow + low == wav. Skip the launch.
        return wav, dict(aux, used_kernel=False)

    # Fused filter: wav - midlow + low = wav + wav (*) (filt_low - filt_midlow), differenced in f32.
    filt_delta = (filters[0] - filters[1]).astype(np.float32)

    assert width <= t_block, "filter width exceeds the time block"
    # Halo: smallest multiple of 128 that covers the filter half-width AND divides t_block, so
    # both halo operands are plain Blocked reads of the neighbouring time block's edge.
    halo = next(h for h in range(128, t_block + 1, 128)
                if h >= width and t_block % h == 0)

    # Stack time sub-blocks as extra LHS rows until ~256 MXU rows are filled or the output
    # sub-tile would drop below 256 lanes (keeps stores lane-dense and the band matrix small).
    n_stack = 1
    while (2 * n_stack * N <= 256
           and t_block % (2 * n_stack) == 0
           and (t_block // (2 * n_stack)) % 128 == 0
           and t_block // (2 * n_stack) >= 256):
        n_stack *= 2
    sub_t = t_block // n_stack
    sub_win = sub_t + 2 * halo

    w_sub = jnp.asarray(banded_delta_matrix(filt_delta, sub_t, halo, width),
                        dtype=compute_dtype)

    wav2d = wav.reshape(N, T)
    nb = T // t_block
    r = t_block // halo                       # halo-sized blocks per time block

    cbytes = jnp.dtype(compute_dtype).itemsize
    est = (2 * 2 * N * t_block * 4            # wav block in + out block, double-buffered, f32
           + 2 * 2 * N * halo * 4             # two halo operands, double-buffered, f32
           + 2 * sub_win * sub_t * cbytes     # banded filter (allow double buffering)
           + N * (t_block + 2 * halo) * (4 + cbytes)       # in-kernel window + cast copy
           + n_stack * N * (sub_win * cbytes + sub_t * 4))  # stacked LHS + f32 delta
    vmem_limit = int(min(max(3 * est, 32 << 20), 48 << 20))

    kernel = functools.partial(bandmask_kernel, n_stack=n_stack, sub_t=sub_t, halo=halo)

    def _launch(single_buffer_w):
        w_kwargs = dict(pipeline_mode=pl.Buffered(1)) if single_buffer_w else {}
        grid_spec = pltpu.PrefetchScalarGridSpec(
            num_scalar_prefetch=0,
            grid=(nb,),
            in_specs=[
                # left halo: tail of the previous time block (zero-masked in-kernel at j == 0)
                pl.BlockSpec((N, halo), lambda j: (0, jnp.maximum(j * r - 1, 0))),
                # exact f32 carrier / centre of the conv window
                pl.BlockSpec((N, t_block), lambda j: (0, j)),
                # right halo: head of the next time block (zero-masked at j == nb-1)
                pl.BlockSpec((N, halo), lambda j: (0, jnp.minimum((j + 1) * r, nb * r - 1))),
                # grid-invariant banded filter: DMA'd once, single-buffered when supported
                pl.BlockSpec((sub_win, sub_t), lambda j: (0, 0), **w_kwargs),
            ],
            out_specs=pl.BlockSpec((N, t_block), lambda j: (0, j)),
        )
        return pl.pallas_call(
            kernel,
            out_shape=jax.ShapeDtypeStruct((N, T), jnp.float32),
            grid_spec=grid_spec,
            compiler_params=pltpu.CompilerParams(
                dimension_semantics=("parallel",),
                vmem_limit_bytes=vmem_limit),
        )(wav2d, wav2d, wav2d, w_sub)

    try:
        out2d = _launch(single_buffer_w=True)
    except Exception:
        # TODO(synk): pl.Buffered(1) rejected on this jax version; fall back to default buffering.
        out2d = _launch(single_buffer_w=False)

    return out2d.reshape(B, C, T), dict(aux, used_kernel=True)


# -------------------------------------- main ---------------------------------------

if __name__ == "__main__":
    key = jax.random.PRNGKey(0)
    B, C, T = 2, 4, 4096
    wav = jax.random.normal(key, (B, C, T), dtype=jnp.float32)

    # numpy reference: F.conv1d is cross-correlation with zero padding = width
    def reference(filters, width):
        wav_np = np.asarray(wav, dtype=np.float32).reshape(B * C, T)
        xpad_np = np.pad(wav_np, ((0, 0), (width, width)))
        low_ref = np.stack([np.correlate(row, filters[0], mode="valid") for row in xpad_np])
        mid_ref = np.stack([np.correlate(row, filters[1], mode="valid") for row in xpad_np])
        return (wav_np - mid_ref + low_ref).reshape(B, C, T)

    # Find a seed whose band draw is non-degenerate so the kernel path is exercised.
    out = aux = None
    for seed in range(64):
        out, aux = band_mask(wav, seed=seed, compute_dtype=jnp.bfloat16)
        if aux["used_kernel"]:
            break
    assert aux is not None and aux["used_kernel"], "no non-degenerate band draw found"

    out = jax.block_until_ready(out)
    assert out.shape == (B, C, T) and out.dtype == jnp.float32
    ref = reference(aux["filters"], aux["width"])
    # bf16 MXU operands, f32 accumulation; the carrier wav is exact f32 so only the small
    # band-limited correction carries bf16 quantization.
    np.testing.assert_allclose(np.asarray(out), ref, rtol=3e-2, atol=3e-2)

    # f32 operand path: validates the fused / banded / halo formulation at higher precision
    # (tolerance still covers the MXU's default f32 matmul precision).
    out_f32, _ = band_mask(wav, seed=seed, compute_dtype=jnp.float32)
    out_f32 = jax.block_until_ready(out_f32)
    np.testing.assert_allclose(np.asarray(out_f32), ref, rtol=2e-2, atol=2e-2)

    print("KERNEL_OK")
</pallas_src>

<mosaic_0001>
module attributes {stable_mosaic.version = 11 : i64} {
  func.func @bandmask_kernel(%arg0: i32, %arg1: memref<8x128xf32, #tpu.memory_space<vmem>>, %arg2: memref<8x1024xf32, #tpu.memory_space<vmem>>, %arg3: memref<8x128xf32, #tpu.memory_space<vmem>>, %arg4: memref<512x256xbf16, #tpu.memory_space<vmem>>, %arg5: memref<8x1024xf32, #tpu.memory_space<vmem>>) attributes {dimension_semantics = [#tpu.dimension_semantics<parallel>], iteration_bounds = array<i64: 4>, scalar_prefetch = 0 : i64, scratch_operands = 0 : i64, tpu.core_type = #tpu.core_type<tc>, window_params = [{transform_indices = @transform_0, window_bounds = array<i64: 8, 128>}, {transform_indices = @transform_1, window_bounds = array<i64: 8, 1024>}, {transform_indices = @transform_2, window_bounds = array<i64: 8, 128>}, {pipeline_mode = #tpu.pipeline_mode<synchronous>, transform_indices = @transform_3, window_bounds = array<i64: 512, 256>}, {transform_indices = @transform_4, window_bounds = array<i64: 8, 1024>}]} {
    %c0_i32 = arith.constant 0 : i32
    %0 = arith.cmpi sgt, %arg0, %c0_i32 : i32
    %1 = arith.extui %0 : i1 to i32
    %2 = arith.sitofp %1 : i32 to f32
    %c3_i32 = arith.constant 3 : i32
    %3 = arith.cmpi slt, %arg0, %c3_i32 : i32
    %4 = arith.extui %3 : i1 to i32
    %5 = arith.sitofp %4 : i32 to f32
    %c0 = arith.constant 0 : index
    %c0_0 = arith.constant 0 : index
    %6 = vector.load %arg1[%c0, %c0_0] : memref<8x128xf32, #tpu.memory_space<vmem>>, vector<8x128xf32>
    %7 = vector.broadcast %2 : f32 to vector<8x128xf32>
    %8 = arith.mulf %6, %7 : vector<8x128xf32>
    %9 = arith.truncf %8 : vector<8x128xf32> to vector<8x128xbf16>
    %c0_1 = arith.constant 0 : index
    %c0_2 = arith.constant 0 : index
    %10 = vector.load %arg3[%c0_1, %c0_2] : memref<8x128xf32, #tpu.memory_space<vmem>>, vector<8x128xf32>
    %11 = vector.broadcast %5 : f32 to vector<8x128xf32>
    %12 = arith.mulf %10, %11 : vector<8x128xf32>
    %13 = arith.truncf %12 : vector<8x128xf32> to vector<8x128xbf16>
    %c0_3 = arith.constant 0 : index
    %c0_4 = arith.constant 0 : index
    %14 = vector.load %arg2[%c0_3, %c0_4] : memref<8x1024xf32, #tpu.memory_space<vmem>>, vector<8x1024xf32>
    %15 = arith.truncf %14 : vector<8x1024xf32> to vector<8x1024xbf16>
    %16 = tpu.concatenate %9, %15, %13 in 1 : vector<8x128xbf16>, vector<8x1024xbf16>, vector<8x128xbf16> -> vector<8x1280xbf16>
    %17 = vector.extract_strided_slice %16 {offsets = [0, 0], sizes = [8, 512], strides = [1, 1]} : vector<8x1280xbf16> to vector<8x512xbf16>
    %18 = vector.extract_strided_slice %16 {offsets = [0, 256], sizes = [8, 512], strides = [1, 1]} : vector<8x1280xbf16> to vector<8x512xbf16>
    %19 = vector.extract_strided_slice %16 {offsets = [0, 512], sizes = [8, 512], strides = [1, 1]} : vector<8x1280xbf16> to vector<8x512xbf16>
    %20 = vector.extract_strided_slice %16 {offsets = [0, 768], sizes = [8, 512], strides = [1, 1]} : vector<8x1280xbf16> to vector<8x512xbf16>
    %21 = tpu.concatenate %17, %18, %19, %20 in 0 : vector<8x512xbf16>, vector<8x512xbf16>, vector<8x512xbf16>, vector<8x512xbf16> -> vector<32x512xbf16>
    %c0_5 = arith.constant 0 : index
    %c0_6 = arith.constant 0 : index
    %22 = vector.load %arg4[%c0_5, %c0_6] : memref<512x256xbf16, #tpu.memory_space<vmem>>, vector<512x256xbf16>
    %cst = arith.constant dense<0.000000e+00> : vector<32x256xf32>
    %23 = tpu.matmul %21, %22, %cst {dimension_numbers = #tpu.dot_dimension_numbers<[1], [0], [0], [1], [0, 0, 1, 1], [], []>} : vector<32x512xbf16>, vector<512x256xbf16>, vector<32x256xf32> -> vector<32x256xf32>
    %24 = vector.extract_strided_slice %14 {offsets = [0, 0], sizes = [8, 256], strides = [1, 1]} : vector<8x1024xf32> to vector<8x256xf32>
    %25 = vector.extract_strided_slice %23 {offsets = [0, 0], sizes = [8, 256], strides = [1, 1]} : vector<32x256xf32> to vector<8x256xf32>
    %26 = arith.addf %24, %25 : vector<8x256xf32>
    %c0_7 = arith.constant 0 : index
    %c0_8 = arith.constant 0 : index
    %27 = vector.load %arg5[%c0_7, %c0_8] : memref<8x1024xf32, #tpu.memory_space<vmem>>, vector<8x256xf32>
    tpu.vector_store %arg5[%c0_7, %c0_8], %26 {strides = array<i32>} : memref<8x1024xf32, #tpu.memory_space<vmem>>, vector<8x256xf32>,
    %28 = vector.extract_strided_slice %14 {offsets = [0, 256], sizes = [8, 256], strides = [1, 1]} : vector<8x1024xf32> to vector<8x256xf32>
    %29 = vector.extract_strided_slice %23 {offsets = [8, 0], sizes = [8, 256], strides = [1, 1]} : vector<32x256xf32> to vector<8x256xf32>
    %30 = arith.addf %28, %29 : vector<8x256xf32>
    %c0_9 = arith.constant 0 : index
    %c256 = arith.constant 256 : index
    %31 = vector.load %arg5[%c0_9, %c256] : memref<8x1024xf32, #tpu.memory_space<vmem>>, vector<8x256xf32>
    tpu.vector_store %arg5[%c0_9, %c256], %30 {strides = array<i32>} : memref<8x1024xf32, #tpu.memory_space<vmem>>, vector<8x256xf32>,
    %32 = vector.extract_strided_slice %14 {offsets = [0, 512], sizes = [8, 256], strides = [1, 1]} : vector<8x1024xf32> to vector<8x256xf32>
    %33 = vector.extract_strided_slice %23 {offsets = [16, 0], sizes = [8, 256], strides = [1, 1]} : vector<32x256xf32> to vector<8x256xf32>
    %34 = arith.addf %32, %33 : vector<8x256xf32>
    %c0_10 = arith.constant 0 : index
    %c512 = arith.constant 512 : index
    %35 = vector.load %arg5[%c0_10, %c512] : memref<8x1024xf32, #tpu.memory_space<vmem>>, vector<8x256xf32>
    tpu.vector_store %arg5[%c0_10, %c512], %34 {strides = array<i32>} : memref<8x1024xf32, #tpu.memory_space<vmem>>, vector<8x256xf32>,
    %36 = vector.extract_strided_slice %14 {offsets = [0, 768], sizes = [8, 256], strides = [1, 1]} : vector<8x1024xf32> to vector<8x256xf32>
    %37 = vector.extract_strided_slice %23 {offsets = [24, 0], sizes = [8, 256], strides = [1, 1]} : vector<32x256xf32> to vector<8x256xf32>
    %38 = arith.addf %36, %37 : vector<8x256xf32>
    %c0_11 = arith.constant 0 : index
    %c768 = arith.constant 768 : index
    %39 = vector.load %arg5[%c0_11, %c768] : memref<8x1024xf32, #tpu.memory_space<vmem>>, vector<8x256xf32>
    tpu.vector_store %arg5[%c0_11, %c768], %38 {strides = array<i32>} : memref<8x1024xf32, #tpu.memory_space<vmem>>, vector<8x256xf32>,
    return
  }
  func.func @transform_0(%arg0: i32) -> (i32, i32) {
    %c8_i32 = arith.constant 8 : i32
    %0 = arith.muli %arg0, %c8_i32 : i32
    %c1_i32 = arith.constant 1 : i32
    %1 = arith.subi %0, %c1_i32 : i32
    %c0_i32 = arith.constant 0 : i32
    %2 = arith.maxsi %1, %c0_i32 : i32
    %c0_i32_0 = arith.constant 0 : i32
    %c0_i32_1 = arith.constant 0 : i32
    return %c0_i32_0, %2 : i32, i32
  }
  func.func @transform_1(%arg0: i32) -> (i32, i32) {
    %c0_i32 = arith.constant 0 : i32
    %c0_i32_0 = arith.constant 0 : i32
    return %c0_i32, %arg0 : i32, i32
  }
  func.func @transform_2(%arg0: i32) -> (i32, i32) {
    %c1_i32 = arith.constant 1 : i32
    %0 = arith.addi %arg0, %c1_i32 : i32
    %c8_i32 = arith.constant 8 : i32
    %1 = arith.muli %0, %c8_i32 : i32
    %c31_i32 = arith.constant 31 : i32
    %2 = arith.minsi %1, %c31_i32 : i32
    %c0_i32 = arith.constant 0 : i32
    %c0_i32_0 = arith.constant 0 : i32
    return %c0_i32, %2 : i32, i32
  }
  func.func @transform_3(%arg0: i32) -> (i32, i32) {
    %c0_i32 = arith.constant 0 : i32
    %c0_i32_0 = arith.constant 0 : i32
    %c0_i32_1 = arith.constant 0 : i32
    return %c0_i32, %c0_i32_0 : i32, i32
  }
  func.func @transform_4(%arg0: i32) -> (i32, i32) {
    %c0_i32 = arith.constant 0 : i32
    %c0_i32_0 = arith.constant 0 : i32
    return %c0_i32, %arg0 : i32, i32
  }
}

module attributes {stable_mosaic.version = 11 : i64} {
  func.func @bandmask_kernel(%arg0: i32, %arg1: memref<8x128xf32, #tpu.memory_space<vmem>>, %arg2: memref<8x1024xf32, #tpu.memory_space<vmem>>, %arg3: memref<8x128xf32, #tpu.memory_space<vmem>>, %arg4: memref<512x256xbf16, #tpu.memory_space<vmem>>, %arg5: memref<8x1024xf32, #tpu.memory_space<vmem>>) attributes {dimension_semantics = [#tpu.dimension_semantics<parallel>], iteration_bounds = array<i64: 4>, scalar_prefetch = 0 : i64, scratch_operands = 0 : i64, tpu.core_type = #tpu.core_type<tc>, window_params = [{transform_indices = @transform_0, window_bounds = array<i64: 8, 128>}, {transform_indices = @transform_1, window_bounds = array<i64: 8, 1024>}, {transform_indices = @transform_2, window_bounds = array<i64: 8, 128>}, {pipeline_mode = #tpu.pipeline_mode<synchronous>, transform_indices = @transform_3, window_bounds = array<i64: 512, 256>}, {transform_indices = @transform_4, window_bounds = array<i64: 8, 1024>}]} {
    %c0_i32 = arith.constant 0 : i32
    %0 = arith.cmpi sgt, %arg0, %c0_i32 : i32
    %1 = arith.extui %0 : i1 to i32
    %2 = arith.sitofp %1 : i32 to f32
    %c3_i32 = arith.constant 3 : i32
    %3 = arith.cmpi slt, %arg0, %c3_i32 : i32
    %4 = arith.extui %3 : i1 to i32
    %5 = arith.sitofp %4 : i32 to f32
    %c0 = arith.constant 0 : index
    %c0_0 = arith.constant 0 : index
    %6 = vector.load %arg1[%c0, %c0_0] : memref<8x128xf32, #tpu.memory_space<vmem>>, vector<8x128xf32>
    %7 = vector.broadcast %2 : f32 to vector<8x128xf32>
    %8 = arith.mulf %6, %7 : vector<8x128xf32>
    %9 = arith.truncf %8 : vector<8x128xf32> to vector<8x128xbf16>
    %c0_1 = arith.constant 0 : index
    %c0_2 = arith.constant 0 : index
    %10 = vector.load %arg3[%c0_1, %c0_2] : memref<8x128xf32, #tpu.memory_space<vmem>>, vector<8x128xf32>
    %11 = vector.broadcast %5 : f32 to vector<8x128xf32>
    %12 = arith.mulf %10, %11 : vector<8x128xf32>
    %13 = arith.truncf %12 : vector<8x128xf32> to vector<8x128xbf16>
    %c0_3 = arith.constant 0 : index
    %c0_4 = arith.constant 0 : index
    %14 = vector.load %arg2[%c0_3, %c0_4] : memref<8x1024xf32, #tpu.memory_space<vmem>>, vector<8x1024xf32>
    %15 = arith.truncf %14 : vector<8x1024xf32> to vector<8x1024xbf16>
    %16 = tpu.concatenate %9, %15, %13 in 1 : vector<8x128xbf16>, vector<8x1024xbf16>, vector<8x128xbf16> -> vector<8x1280xbf16>
    %17 = vector.extract_strided_slice %16 {offsets = [0, 0], sizes = [8, 512], strides = [1, 1]} : vector<8x1280xbf16> to vector<8x512xbf16>
    %18 = vector.extract_strided_slice %16 {offsets = [0, 256], sizes = [8, 512], strides = [1, 1]} : vector<8x1280xbf16> to vector<8x512xbf16>
    %19 = vector.extract_strided_slice %16 {offsets = [0, 512], sizes = [8, 512], strides = [1, 1]} : vector<8x1280xbf16> to vector<8x512xbf16>
    %20 = vector.extract_strided_slice %16 {offsets = [0, 768], sizes = [8, 512], strides = [1, 1]} : vector<8x1280xbf16> to vector<8x512xbf16>
    %21 = tpu.concatenate %17, %18, %19, %20 in 0 : vector<8x512xbf16>, vector<8x512xbf16>, vector<8x512xbf16>, vector<8x512xbf16> -> vector<32x512xbf16>
    %c0_5 = arith.constant 0 : index
    %c0_6 = arith.constant 0 : index
    %22 = vector.load %arg4[%c0_5, %c0_6] : memref<512x256xbf16, #tpu.memory_space<vmem>>, vector<512x256xbf16>
    %cst = arith.constant dense<0.000000e+00> : vector<32x256xf32>
    %23 = tpu.matmul %21, %22, %cst {dimension_numbers = #tpu.dot_dimension_numbers<[1], [0], [0], [1], [0, 0, 1, 1], [], []>} : vector<32x512xbf16>, vector<512x256xbf16>, vector<32x256xf32> -> vector<32x256xf32>
    %24 = vector.extract_strided_slice %14 {offsets = [0, 0], sizes = [8, 256], strides = [1, 1]} : vector<8x1024xf32> to vector<8x256xf32>
    %25 = vector.extract_strided_slice %23 {offsets = [0, 0], sizes = [8, 256], strides = [1, 1]} : vector<32x256xf32> to vector<8x256xf32>
    %26 = arith.addf %24, %25 : vector<8x256xf32>
    %c0_7 = arith.constant 0 : index
    %c0_8 = arith.constant 0 : index
    %27 = vector.load %arg5[%c0_7, %c0_8] : memref<8x1024xf32, #tpu.memory_space<vmem>>, vector<8x256xf32>
    tpu.vector_store %arg5[%c0_7, %c0_8], %26 {strides = array<i32>} : memref<8x1024xf32, #tpu.memory_space<vmem>>, vector<8x256xf32>,
    %28 = vector.extract_strided_slice %14 {offsets = [0, 256], sizes = [8, 256], strides = [1, 1]} : vector<8x1024xf32> to vector<8x256xf32>
    %29 = vector.extract_strided_slice %23 {offsets = [8, 0], sizes = [8, 256], strides = [1, 1]} : vector<32x256xf32> to vector<8x256xf32>
    %30 = arith.addf %28, %29 : vector<8x256xf32>
    %c0_9 = arith.constant 0 : index
    %c256 = arith.constant 256 : index
    %31 = vector.load %arg5[%c0_9, %c256] : memref<8x1024xf32, #tpu.memory_space<vmem>>, vector<8x256xf32>
    tpu.vector_store %arg5[%c0_9, %c256], %30 {strides = array<i32>} : memref<8x1024xf32, #tpu.memory_space<vmem>>, vector<8x256xf32>,
    %32 = vector.extract_strided_slice %14 {offsets = [0, 512], sizes = [8, 256], strides = [1, 1]} : vector<8x1024xf32> to vector<8x256xf32>
    %33 = vector.extract_strided_slice %23 {offsets = [16, 0], sizes = [8, 256], strides = [1, 1]} : vector<32x256xf32> to vector<8x256xf32>
    %34 = arith.addf %32, %33 : vector<8x256xf32>
    %c0_10 = arith.constant 0 : index
    %c512 = arith.constant 512 : index
    %35 = vector.load %arg5[%c0_10, %c512] : memref<8x1024xf32, #tpu.memory_space<vmem>>, vector<8x256xf32>
    tpu.vector_store %arg5[%c0_10, %c512], %34 {strides = array<i32>} : memref<8x1024xf32, #tpu.memory_space<vmem>>, vector<8x256xf32>,
    %36 = vector.extract_strided_slice %14 {offsets = [0, 768], sizes = [8, 256], strides = [1, 1]} : vector<8x1024xf32> to vector<8x256xf32>
    %37 = vector.extract_strided_slice %23 {offsets = [24, 0], sizes = [8, 256], strides = [1, 1]} : vector<32x256xf32> to vector<8x256xf32>
    %38 = arith.addf %36, %37 : vector<8x256xf32>
    %c0_11 = arith.constant 0 : index
    %c768 = arith.constant 768 : index
    %39 = vector.load %arg5[%c0_11, %c768] : memref<8x1024xf32, #tpu.memory_space<vmem>>, vector<8x256xf32>
    tpu.vector_store %arg5[%c0_11, %c768], %38 {strides = array<i32>} : memref<8x1024xf32, #tpu.memory_space<vmem>>, vector<8x256xf32>,
    return
  }
  func.func @transform_0(%arg0: i32) -> (i32, i32) {
    %c8_i32 = arith.constant 8 : i32
    %0 = arith.muli %arg0, %c8_i32 : i32
    %c1_i32 = arith.constant 1 : i32
    %1 = arith.subi %0, %c1_i32 : i32
    %c0_i32 = arith.constant 0 : i32
    %2 = arith.maxsi %1, %c0_i32 : i32
    %c0_i32_0 = arith.constant 0 : i32
    %c0_i32_1 = arith.constant 0 : i32
    return %c0_i32_0, %2 : i32, i32
  }
  func.func @transform_1(%arg0: i32) -> (i32, i32) {
    %c0_i32 = arith.constant 0 : i32
    %c0_i32_0 = arith.constant 0 : i32
    return %c0_i32, %arg0 : i32, i32
  }
  func.func @transform_2(%arg0: i32) -> (i32, i32) {
    %c1_i32 = arith.constant 1 : i32
    %0 = arith.addi %arg0, %c1_i32 : i32
    %c8_i32 = arith.constant 8 : i32
    %1 = arith.muli %0, %c8_i32 : i32
    %c31_i32 = arith.constant 31 : i32
    %2 = arith.minsi %1, %c31_i32 : i32
    %c0_i32 = arith.constant 0 : i32
    %c0_i32_0 = arith.constant 0 : i32
    return %c0_i32, %2 : i32, i32
  }
  func.func @transform_3(%arg0: i32) -> (i32, i32) {
    %c0_i32 = arith.constant 0 : i32
    %c0_i32_0 = arith.constant 0 : i32
    %c0_i32_1 = arith.constant 0 : i32
    return %c0_i32, %c0_i32_0 : i32, i32
  }
  func.func @transform_4(%arg0: i32) -> (i32, i32) {
    %c0_i32 = arith.constant 0 : i32
    %c0_i32_0 = arith.constant 0 : i32
    return %c0_i32, %arg0 : i32, i32
  }
}

</mosaic_0001>

<bundles_post_ra>
// kernel: tpu_custom_call.1
= control target key start
LH: loop header
LB: loop body
LE: loop exit
PB: predicated region body
PF: predicated region fallthrough
CT: control target
= control target key end

     0   :  { %s2120_s0 = inlined_call_operand.hbm [shape: f32[8,4096], index: 0, kind: input, shape index: {}]   ;;  %s2121_s1 = inlined_call_operand.hbm [shape: f32[8,4096], index: 1, kind: input, shape index: {}]   ;;  %s2122_s2 = inlined_call_operand.hbm [shape: f32[8,4096], index: 2, kind: input, shape index: {}]   ;;  %s2123_s3 = inlined_call_operand.hbm [shape: bf16[512,256], index: 3, kind: input, shape index: {}]   ;;  %s2124_s4 = inlined_call_operand.hbm [shape: f32[8,4096], index: 4, kind: output, shape index: {}]  }
   0x1   :  { %2137 = sst [smem:[#allocation20_spill]] %s2121_s1 }
   0x2   :  { %2138 = sst [smem:[#allocation21_spill]] %s2123_s3 }
   0x3   :  { %9 = vsyncpa [#allocation3], 0 }
   0x4   :  { %11 = vsyncpa [#allocation3 + $0x1], 0 }
   0x5   :  { %12 = vsyncpa [#allocation6], 0 }
   0x6   :  { %14 = vsyncpa [#allocation6 + $0x1], 0 }
   0x7   :  { %15 = vsyncpa [#allocation9], 0 }
   0x8   :  { %16 = vsyncpa [#allocation4], 0 }
   0x9   :  { %18 = vsyncpa [#allocation4 + $0x1], 0  ;;  %s1663_s15 = smov 0   ;;  %s1665_s16 = smov 0  }
   0xa   :  { %s1667_s17 = smov 0   ;;  %s1669_s18 = smov 0  }
   0xb   :  { %s1671_s19 = smov 0   ;;  %s1673_s20 = smov 0  }
   0xc   :  { %s1675_s21 = smov 0   ;;  %s1677_s22 = smov 0  }
   0xd   :  { %s1679_s23 = smov 0   ;;  %s1681_s24 = smov 0  }
   0xe LB: > { %2139 = sst [smem:[#allocation16_spill]] %s1613_s20  ;;  %s1714_s25 = sadd.s32 4294967295, %s1629_s24   ;;  %s1629_s24 = sphi %s1681_s24, %s2175_s24   ;;  %s1625_s23 = sphi %s1679_s23, %s2185_s23   ;;  %s1621_s22 = sphi %s1677_s22, %s2184_s22   ;;  %s1617_s21 = sphi %s1675_s21, %s2183_s21   ;;  %s1613_s20 = sphi %s1673_s20, %s2177_s20   ;;  %s1609_s19 = sphi %s1671_s19, %s2182_s19   ;;  %s1605_s18 = sphi %s1669_s18, %s2181_s18   ;;  %s1601_s17 = sphi %s1667_s17, %s2180_s17   ;;  %s1597_s16 = sphi %s1665_s16, %s2179_s16   ;;  %s1593_s15 = sphi %s1663_s15, %s2178_s15  }
   0xf   : > { %s1057_s26 = sadd.s32 4294967294, %s1629_s24   ;;  %s1718_s27 = sadd.s32 1, %s1629_s24  }
  0x10   : > { %2140 = sst [smem:[#allocation17_spill]] %s1718_s27  ;;  %p2126_p0 = scmp.eq.s32.totalorder %s1629_s24, 0 }
  0x11   : > { %p2127_p1 = scmp.eq.s32.totalorder %s1714_s25, 0  ;;  %s62_s28 = ssub.s32 %s1629_s24, %s1718_s27 }
  0x12   : > { %p63_p2 = scmp.eq.s32.totalorder %s62_s28, 0  ;;  %s65_s29 = sadd.s32 1, %s1613_s20 }
  0x13   : > { %p72_p3 = scmp.ne.s32.totalorder %s1613_s20, %s1609_s19  ;;  %p78_p4 = scmp.ne.s32.totalorder %s1609_s19, %s1605_s18 }
  0x14   : > { %s1730_s30 = scalar_select %p63_p2, %s1613_s20, %s65_s29  }
  0x15   : > { %p1734_p5 = por %p72_p3, %p2126_p0  ;;  %p1740_p6 = por %p78_p4, %p2127_p1 }
  0x16   : > { %2141 = sst [smem:[#allocation18_spill]] %s1730_s30  ;;  %p157_p7 = scmp.eq.s32.totalorder %s1714_s25, 3 }
  0x17   : > { %s2143_s6 = scalar_select %p1740_p6, 1, 0 }
  0x18   : > { %p163_p8 = scmp.eq.s32.totalorder %s1057_s26, 3  ;;  %p1745_p9 = por %p157_p7, %p72_p3 }
  0x19   : > { %p2125_p11 = scmp.lt.s32.totalorder %s1629_s24, 4  ;;  %s218_s9 = sand.u32 1, %s1629_s24  }
  0x1a   : > { %s2144_s7 = scalar_select %p1745_p9, 1, 0 }
  0x1b   : > { %p1749_p10 = por %p163_p8, %p78_p4  ;;  %s220_s10 = sand.u32 1, %s1613_s20  }
  0x1c   : > { %s1071_s11 = sshll.u32 %s220_s10, 6  ;;  %s1158_s12 = sshll.u32 %s1629_s24, 10 }
  0x1d   : > { %s2145_s8 = scalar_select %p1749_p10, 1, 0 }
  0x1e   : > { %s2147_s1 = sld [smem:[#allocation20_spill]]  ;;  %s222_s26 = scalar_lea.vmem [#allocation5], %s1071_s11 }
  0x1f   : > { %2146 = sst [smem:[#allocation19_spill]] %s2145_s8  ;;  %s230_s29 = sshll.u32 %s222_s26, 4  ;;  %s1770_s29 = int_to_ptr.vmem [resolvable:$true] %s230_s29 }
  0x20   : > { %p1766_p12 = pnand %p2125_p11, %p1734_p5  ;;  %s1774_s10 = scalar_lea.sflag [#allocation6], %s218_s9 }
  0x22   : > { %p1387_p4 = pneg %p1766_p12 }
  0x24   : > { %s1760_s28 = scalar_lea.hbm %s2147_s1, %s1158_s12  ;;  %s1390_s13 = scalar_lea.hbm %s2147_s1, 4096 }
  0x25   : > { %s1385_s12 = scalar_lea.hbm %s1760_s28, 1024  ;;  %p1391_p5 = scmp.lt.u32.totalorder %s1760_s28, %s2147_s1 }
  0x26   : > { %p1386_p3 = scmp.ne.s32.totalorder %s1760_s28, %s1385_s12  ;;  %p1392_p11 = scmp.lt.u32.totalorder %s1390_s13, %s1385_s12 }
  0x27   : > { %p1394_p1 = scmp.lt.u32.totalorder %s1385_s12, %s1760_s28 }
  0x28   : > { %p1388_p7 = pnand %p1387_p4, %p1386_p3  ;;  %p1393_p0 = por %p1392_p11, %p1391_p5 }
  0x2a   : > { %p1389_p8 = pneg %p1388_p7  ;;  %p1395_p13 = por %p1394_p1, %p1393_p0 }
  0x2c   : > { %p1396_p2 = pnand %p1395_p13, %p1389_p8 }
  0x2e   : > { %1399 = shalt.err (!%p1396_p2)
}
  0x2f   : > { %s1400_s9 = scalar_lea.vmem %s1770_s29, 1024  ;;  %s1631_s5 = smov [#allocation5]  }
  0x30   : > { %p1401_p3 = scmp.ne.s32.totalorder %s1770_s29, %s1400_s9  ;;  %s1405_s11 = sshll.u32 %s1631_s5, 4  ;;  %s1406_s11 = int_to_ptr.vmem [resolvable:$false] %s1405_s11 }
  0x31   : > { %s1407_s14 = scalar_lea.vmem %s1406_s11, 2048  ;;  %p1408_p9 = scmp.lt.s32.totalorder %s1770_s29, %s1406_s11 }
  0x32   : > { %p1403_p7 = pnand %p1401_p3, %p1387_p4  ;;  %p1409_p11 = scmp.lt.s32.totalorder %s1407_s14, %s1400_s9 }
  0x34   : > { %p1404_p10 = pneg %p1403_p7  ;;  %p1410_p5 = por %p1409_p11, %p1408_p9 }
  0x36   : > { %p1411_p0 = pnand %p1410_p5, %p1404_p10 }
  0x38   : > { %1414 = shalt.err (!%p1411_p0)
}
  0x39   : > { %1194 = dma.hbm_to_vmem [thread:$0]  (!%p1766_p12), %s1760_s28, 1024, %s1770_s29, %s1774_s10  }
  0x3a   : > { %p2149_p1 = scmp.lt.s32.totalorder %s1629_s24, 5  ;;  %p2150_p13 = scmp.ge.s32.totalorder %s1629_s24, 1 }
  0x3b   : > { %s1632_s13 = smov [#allocation8]   ;;  %p2152_p10 = scmp.eq.s32.totalorder %s1714_s25, 0 }
  0x3c   : > { %p1806_p2 = pnand %p2150_p13, %p2149_p1  ;;  %s182_s26 = sshll.u32 %s1632_s13, 4  ;;  %s183_s26 = int_to_ptr.vmem [resolvable:$true] %s182_s26 }
  0x3d   : > { %s2154_s3 = sld [smem:[#allocation21_spill]] }
  0x3e   : > { %s2151_s12 = scalar_select %p1806_p2, 1, 0 }
  0x3f   : > { %p1184_p9 = pneg %p1806_p2 }
  0x41   : > { %p1814_p4 = pnand %p1184_p9, %p2152_p10 }
  0x43   : > { %s1415_s28 = scalar_lea.hbm %s2154_s3, 8192  ;;  %p1417_p8 = pneg %p1814_p4 }
  0x44   : > { %p1416_p12 = scmp.ne.s32.totalorder %s2154_s3, %s1415_s28  ;;  %p1422_p11 = scmp.lt.u32.totalorder %s1415_s28, %s2154_s3 }
  0x46   : > { %p1418_p3 = pnand %p1417_p8, %p1416_p12 }
  0x48   : > { %p1419_p7 = pneg %p1418_p3 }
  0x4a   : > { %p1424_p5 = pnand %p1422_p11, %p1419_p7 }
  0x4c   : > { %1427 = shalt.err (!%p1424_p5)
}
  0x4d   : > { %s1428_s1 = scalar_lea.vmem %s183_s26, 8192  ;;  %p1436_p9 = scmp.lt.s32.totalorder %s183_s26, %s183_s26 }
  0x4e   : > { %p1429_p0 = scmp.ne.s32.totalorder %s183_s26, %s1428_s1  ;;  %p1437_p10 = scmp.lt.s32.totalorder %s1428_s1, %s1428_s1 }
  0x50   : > { %p1431_p1 = pnand %p1429_p0, %p1417_p8  ;;  %p1438_p6 = por %p1437_p10, %p1436_p9 }
  0x52   : > { %p1432_p13 = pneg %p1431_p1 }
  0x54   : > { %p1439_p2 = pnand %p1438_p6, %p1432_p13 }
  0x56   : > { %1442 = shalt.err (!%p1439_p2)
}
  0x57   : > { %s1633_s9 = smov 128   ;;  %s1634_s5 = smov 8  }
  0x58   : > { %1187 = dma.hbm_to_vmem [thread:$0]  (!%p1814_p4), %s2154_s3, 8192, %s183_s26, [#allocation9], %s1633_s9, %s1633_s9, %s1634_s5  }
  0x59   : > { %s1058_s1 = sshll.u32 %s1629_s24, 3  ;;  %s39_s20 = sadd.s32 1, %s1625_s23 }
  0x5a   : > { %s1059_s11 = sadd.s32 4294967295, %s1058_s1  ;;  %s1835_s14 = sadd.s32 8, %s1058_s1 }
  0x5b   : > { %p30_p6 = scmp.gt.s32.totalorder %s1059_s11, 0  ;;  %s1061_s13 = sadd.s32 4294967295, %s1835_s14 }
  0x5c   : > { %p34_p2 = scmp.gt.s32.totalorder %s1061_s13, 0  ;;  %p46_p12 = scmp.ne.s32.totalorder %s1625_s23, %s1621_s22 }
  0x5d   : > { %s2187_s11 = smov (!%p30_p6, %s1059_s11), 0  ;;  %p52_p8 = scmp.ne.s32.totalorder %s1621_s22, %s1617_s21 }
  0x5e   : > { %s2189_s13 = smov (!%p34_p2, %s1061_s13), 0  ;;  %s2135_s30 = sadd.s32 8, %s1835_s14 }
  0x5f   : > { %s36_s26 = ssub.s32 %s2187_s11, %s2189_s13  ;;  %p2155_p3 = scmp.eq.s32.totalorder %s1629_s24, 0 }
  0x60   : > { %p37_p4 = scmp.eq.s32.totalorder %s36_s26, 0  ;;  %p2156_p11 = scmp.eq.s32.totalorder %s1714_s25, 0 }
  0x61   : > { %p48_p7 = por %p2155_p3, %p46_p12  ;;  %p1854_p0 = scmp.lt.s32.totalorder %s2135_s30, 31 }
  0x62   : > { %p1848_p5 = por %p2156_p11, %p52_p8  ;;  %s196_s29 = sand.u32 1, %s1625_s23  }
  0x63   : > { %s1859_s28 = scalar_select %p37_p4, %s1625_s23, %s39_s20  }
  0x64   : > { %s2157_s9 = scalar_select %p1848_p5, 1, 0 }
  0x65   : > { %s1070_s1 = sshll.u32 %s2187_s11, 7  ;;  %s1067_s21 = sshll.u32 %s196_s29, 3 }
  0x66   : > { %s1865_s26 = scalar_lea.hbm %s2120_s0, %s1070_s1  ;;  %s200_s27 = scalar_lea.vmem [#allocation2], %s1067_s21 }
  0x67   : > { %s211_s8 = sshll.u32 %s200_s27, 4  ;;  %p2159_p1 = scmp.lt.s32.totalorder %s1629_s24, 4  ;;  %s1873_s8 = int_to_ptr.vmem [resolvable:$true] %s211_s8 }
  0x68   : > { %s197_s20 = scalar_lea.sflag [#allocation3], %s196_s29  ;;  %s1443_s11 = scalar_lea.hbm %s1865_s26, 128 }
  0x69   : > { %p1869_p13 = pnand %p2159_p1, %p48_p7  ;;  %p1444_p9 = scmp.ne.s32.totalorder %s1865_s26, %s1443_s11 }
  0x6a   : > { %s1448_s1 = scalar_lea.hbm %s2120_s0, 4096  ;;  %p1449_p12 = scmp.lt.u32.totalorder %s1865_s26, %s2120_s0 }
  0x6b   : > { %p1445_p10 = pneg %p1869_p13  ;;  %p1450_p8 = scmp.lt.u32.totalorder %s1448_s1, %s1443_s11 }
  0x6c   : > { %p1452_p3 = scmp.lt.u32.totalorder %s1443_s11, %s1865_s26 }
  0x6d   : > { %p1446_p6 = pnand %p1445_p10, %p1444_p9  ;;  %p1451_p4 = por %p1450_p8, %p1449_p12 }
  0x6f   : > { %p1447_p2 = pneg %p1446_p6  ;;  %p1453_p7 = por %p1452_p3, %p1451_p4 }
  0x71   : > { %p1454_p11 = pnand %p1453_p7, %p1447_p2 }
  0x73   : > { %1457 = shalt.err (!%p1454_p11)
}
  0x74   : > { %s1458_s29 = scalar_lea.vmem %s1873_s8, 128  ;;  %s1635_s3 = smov [#allocation2]  }
  0x75   : > { %p1459_p1 = scmp.ne.s32.totalorder %s1873_s8, %s1458_s29  ;;  %s1463_s27 = sshll.u32 %s1635_s3, 4  ;;  %s1464_s27 = int_to_ptr.vmem [resolvable:$false] %s1463_s27 }
  0x76   : > { %s1465_s21 = scalar_lea.vmem %s1464_s27, 256  ;;  %p1466_p5 = scmp.lt.s32.totalorder %s1873_s8, %s1464_s27 }
  0x77   : > { %p1461_p9 = pnand %p1459_p1, %p1445_p10  ;;  %p1467_p12 = scmp.lt.s32.totalorder %s1465_s21, %s1458_s29 }
  0x79   : > { %p1462_p6 = pneg %p1461_p9  ;;  %p1468_p8 = por %p1467_p12, %p1466_p5 }
  0x7b   : > { %p1469_p4 = pnand %p1468_p8, %p1462_p6 }
  0x7d   : > { %1472 = shalt.err (!%p1469_p4)
}
  0x7e   : > { %1191 = dma.hbm_to_vmem [thread:$0]  (!%p1869_p13), %s1865_s26, 128, %s1873_s8, %s197_s20  }
  0x7f   : > { %p90_p5 = scmp.lt.s32.totalorder %s1835_s14, 31  ;;  %s99_s11 = sadd.s32 1, %s1601_s17 }
  0x80   : > { %s2161_s1 = sadd.s32 8, %s1835_s14  ;;  %p106_p10 = scmp.ne.s32.totalorder %s1601_s17, %s1597_s16 }
  0x81   : > { %s2191_s1 = smov (!%p1854_p0, %s2161_s1), 31  ;;  %s2193_s14 = smov (!%p90_p5, %s1835_s14), 31 }
  0x82   : > { %p112_p2 = scmp.ne.s32.totalorder %s1597_s16, %s1593_s15  ;;  %s96_s30 = ssub.s32 %s2193_s14, %s2191_s1 }
  0x83   : > { %s239_s13 = sand.u32 1, %s1601_s17   ;;  %p97_p3 = scmp.eq.s32.totalorder %s96_s30, 0 }
  0x84   : > { %p2162_p7 = scmp.eq.s32.totalorder %s1629_s24, 0  ;;  %p2163_p1 = scmp.eq.s32.totalorder %s1714_s25, 0 }
  0x85   : > { %s1074_s8 = sshll.u32 %s239_s13, 3  ;;  %s1076_s20 = sshll.u32 %s2193_s14, 7 }
  0x86   : > { %p108_p11 = por %p106_p10, %p2162_p7  ;;  %p1916_p9 = por %p112_p2, %p2163_p1 }
  0x87   : > { %s1921_s26 = scalar_select %p97_p3, %s1601_s17, %s99_s11  }
  0x88   : > { %s1926_s27 = scalar_lea.hbm %s2122_s2, %s1076_s20  ;;  %s241_s15 = scalar_lea.vmem [#allocation7], %s1074_s8 }
  0x89   : > { %s252_s21 = sshll.u32 %s241_s15, 4  ;;  %p2165_p0 = scmp.lt.s32.totalorder %s1629_s24, 4  ;;  %s1928_s21 = int_to_ptr.vmem [resolvable:$true] %s252_s21 }
  0x8a   : > { %s1473_s14 = scalar_lea.hbm %s1926_s27, 128  ;;  %s1478_s13 = scalar_lea.hbm %s2122_s2, 4096 }
  0x8b   : > { %p1932_p13 = pnand %p2165_p0, %p108_p11  ;;  %p1474_p6 = scmp.ne.s32.totalorder %s1926_s27, %s1473_s14 }
  0x8c   : > { %p1479_p5 = scmp.lt.u32.totalorder %s1926_s27, %s2122_s2  ;;  %p1480_p10 = scmp.lt.u32.totalorder %s1478_s13, %s1473_s14 }
  0x8d   : > { %p1475_p12 = pneg %p1932_p13  ;;  %p1482_p3 = scmp.lt.u32.totalorder %s1473_s14, %s1926_s27 }
  0x8e   : > { %p1481_p2 = por %p1480_p10, %p1479_p5 }
  0x8f   : > { %p1476_p8 = pnand %p1475_p12, %p1474_p6 }
  0x90   : > { %p1483_p7 = por %p1482_p3, %p1481_p2 }
  0x91   : > { %p1477_p4 = pneg %p1476_p8 }
  0x93   : > { %p1484_p11 = pnand %p1483_p7, %p1477_p4 }
  0x95   : > { %1487 = shalt.err (!%p1484_p11)
}
  0x96   : > { %s1488_s5 = scalar_lea.vmem %s1928_s21, 128  ;;  %s1636_s3 = smov [#allocation7]  }
  0x97   : > { %p1489_p1 = scmp.ne.s32.totalorder %s1928_s21, %s1488_s5  ;;  %s1493_s15 = sshll.u32 %s1636_s3, 4  ;;  %s1494_s15 = int_to_ptr.vmem [resolvable:$false] %s1493_s15 }
  0x98   : > { %s1495_s11 = scalar_lea.vmem %s1494_s15, 256  ;;  %p1496_p8 = scmp.lt.s32.totalorder %s1928_s21, %s1494_s15 }
  0x99   : > { %p1491_p0 = pnand %p1489_p1, %p1475_p12  ;;  %p1497_p5 = scmp.lt.s32.totalorder %s1495_s11, %s1488_s5 }
  0x9b   : > { %p1492_p6 = pneg %p1491_p0  ;;  %p1498_p10 = por %p1497_p5, %p1496_p8 }
  0x9d   : > { %p1499_p2 = pnand %p1498_p10, %p1492_p6 }
  0x9f   : > { %1502 = shalt.err (!%p1499_p2)
}
  0xa0   : > { %1197 = dma.hbm_to_vmem [thread:$0]  (!%p1932_p13), %s1926_s27, 128, %s1928_s21, %s1774_s10  }
  0xa1   : > { %p2167_p4 = scmp.ne.s32.totalorder %s2151_s12, 0 }
  0xa2   : > { %s263_s14 = sand.u32 (!%p2167_p4), 1, %s1621_s22   ;;  %p2168_p12 = scmp.ne.s32.totalorder (!%p2167_p4), %s2157_s9, 0 }
  0xa3   : > { %261 = sbr.rel (%p2167_p4) target bundleno = 490 (0x1ea), region = 36  ;;  %s1965_s30 = sshll.u32 (!%p2167_p4), %s263_s14, 3 }
  0xa4   : > { %s264_s13 = scalar_lea.sflag (!%p2167_p4), [#allocation3], %s263_s14  ;;  %s267_s8 = scalar_lea.vmem (!%p2167_p4), [#allocation2], %s1965_s30 }
  0xaa   : > { %1572 = dma.done.wait (%p2168_p12), %s264_s13, 128  }
  0xab   : > { %1574 = vsyncadd (%p2168_p12), %s264_s13, 4294967168  ;;  %s272_s10 = sand.u32 1, %s1714_s25   ;;  %s274_s12 = sand.u32 1, %s1609_s19  }
  0xac   : > { %s1976_s27 = sshll.u32 %s274_s12, 6  ;;  %s273_s21 = scalar_lea.sflag [#allocation6], %s272_s10 }
  0xad   : > { %s1979_s1 = scalar_lea.vmem [#allocation5], %s1976_s27  ;;  %p2169_p13 = scmp.ne.s32.totalorder %s2143_s6, 0 }
  0xaf   : > { %1576 = dma.done.wait (%p2169_p13), %s273_s21, 1024  }
  0xb0   : > { %1578 = vsyncadd (%p2169_p13), %s273_s21, 4294966272  ;;  %s283_s9 = sand.u32 1, %s1597_s16  }
  0xb1   : > { %s1986_s20 = sshll.u32 %s283_s9, 3 }
  0xb2   : > { %s285_s5 = scalar_lea.vmem [#allocation7], %s1986_s20 }
  0xb3   : > { %1580 = dma.done.wait (%p1916_p9), %s273_s21, 128  }
  0xb4   : > { %1582 = vsyncadd (%p1916_p9), %s273_s21, 4294967168  ;;  %p2170_p3 = scmp.eq.s32.totalorder %s1714_s25, 0 }
  0xb6   : > { %1584 = dma.done.wait (%p2170_p3), [#allocation9], 8192   ;;  %p2171_p7 = pmov %p2170_p3 }
  0xb7   : > { %v1289_v0 = vld [vmem:[#allocation8 + $0x4] ss:$8 sps:$4 sm:$0xff]   ;;  %v1293_v2 = vld [vmem:[#allocation8] ss:$8 sps:$4 sm:$0xff]   ;;  %v1295_v4 = vld [vmem:[#allocation8 + $0x14] ss:$8 sps:$4 sm:$0xff]  }
  0xb8   : > { %1586 = vsyncadd (%p2171_p7), [#allocation9], 4294959104  ;;  %v1291_v1 = vld [vmem:[#allocation8 + $0x104] ss:$8 sps:$4 sm:$0xff]   ;;  %797 = vmatprep.subr.bf16.mxu1 %v1289_v0  ;;  %v1294_v3 = vld [vmem:[#allocation8 + $0x100] ss:$8 sps:$4 sm:$0xff]  }
  0xb9   : > { %850 = vmatprep.subr.bf16.mxu0 %v1291_v1  ;;  %798 = vmatpush1.bf16.msra.mxu1 %v1293_v2  ;;  %v1297_v5 = vld [vmem:[#allocation8 + $0x114] ss:$8 sps:$4 sm:$0xff]   ;;  %v1299_v6 = vld [vmem:[#allocation8 + $0x10] ss:$8 sps:$4 sm:$0xff]   ;;  %v1301_v8 = vld [vmem:[#allocation8 + $0x24] ss:$8 sps:$4 sm:$0xff]  }
  0xba   : > { %851 = vmatpush1.bf16.msra.mxu0 %v1294_v3  ;;  %799 = vmatprep.subr.bf16.mxu1 %v1295_v4  ;;  %v1300_v7 = vld [vmem:[#allocation8 + $0x110] ss:$8 sps:$4 sm:$0xff]   ;;  %v1303_v9 = vld [vmem:[#allocation8 + $0x124] ss:$8 sps:$4 sm:$0xff]   ;;  %v1305_v10 = vld [vmem:[#allocation8 + $0x20] ss:$8 sps:$4 sm:$0xff]  }
  0xbb   : > { %852 = vmatprep.subr.bf16.mxu0 %v1297_v5  ;;  %v1306_v11 = vld [vmem:[#allocation8 + $0x120] ss:$8 sps:$4 sm:$0xff]   ;;  %v1307_v12 = vld [vmem:[#allocation8 + $0x34] ss:$8 sps:$4 sm:$0xff]   ;;  %v1311_v14 = vld [vmem:[#allocation8 + $0x30] ss:$8 sps:$4 sm:$0xff]  }
  0xbc   : > { %v1309_v13 = vld [vmem:[#allocation8 + $0x134] ss:$8 sps:$4 sm:$0xff]   ;;  %v1312_v15 = vld [vmem:[#allocation8 + $0x130] ss:$8 sps:$4 sm:$0xff]   ;;  %v1313_v16 = vld [vmem:[#allocation8 + $0x44] ss:$8 sps:$4 sm:$0xff]  }
  0xbd   : > { %800 = vmatpush1.bf16.msra.mxu1 %v1299_v6  ;;  %v1315_v17 = vld [vmem:[#allocation8 + $0x144] ss:$8 sps:$4 sm:$0xff]   ;;  %v1317_v18 = vld [vmem:[#allocation8 + $0x40] ss:$8 sps:$4 sm:$0xff]   ;;  %v1319_v20 = vld [vmem:[#allocation8 + $0x54] ss:$8 sps:$4 sm:$0xff]  }
  0xbe   : > { %853 = vmatpush1.bf16.msra.mxu0 %v1300_v7  ;;  %801 = vmatprep.subr.bf16.mxu1 %v1301_v8  ;;  %v1318_v19 = vld [vmem:[#allocation8 + $0x140] ss:$8 sps:$4 sm:$0xff]   ;;  %v1321_v21 = vld [vmem:[#allocation8 + $0x154] ss:$8 sps:$4 sm:$0xff]   ;;  %v1323_v22 = vld [vmem:[#allocation8 + $0x50] ss:$8 sps:$4 sm:$0xff]  }
  0xbf   : > { %854 = vmatprep.subr.bf16.mxu0 %v1303_v9  ;;  %v1324_v23 = vld [vmem:[#allocation8 + $0x150] ss:$8 sps:$4 sm:$0xff]   ;;  %v1325_v24 = vld [vmem:[#allocation8 + $0x64] ss:$8 sps:$4 sm:$0xff]   ;;  %v1329_v26 = vld [vmem:[#allocation8 + $0x60] ss:$8 sps:$4 sm:$0xff]  }
  0xc0   : > { %v1327_v25 = vld [vmem:[#allocation8 + $0x164] ss:$8 sps:$4 sm:$0xff]   ;;  %v1330_v27 = vld [vmem:[#allocation8 + $0x160] ss:$8 sps:$4 sm:$0xff]   ;;  %v1331_v28 = vld [vmem:[#allocation8 + $0x74] ss:$8 sps:$4 sm:$0xff]  }
  0xc1   : > { %802 = vmatpush1.bf16.msra.mxu1 %v1305_v10  ;;  %v1333_v29 = vld [vmem:[#allocation8 + $0x174] ss:$8 sps:$4 sm:$0xff]   ;;  %v1335_v30 = vld [vmem:[#allocation8 + $0x70] ss:$8 sps:$4 sm:$0xff]   ;;  %v1337_v32 = vld [vmem:[#allocation8 + $0x84] ss:$8 sps:$4 sm:$0xff]  }
  0xc2   : > { %855 = vmatpush1.bf16.msra.mxu0 %v1306_v11  ;;  %803 = vmatprep.subr.bf16.mxu1 %v1307_v12  ;;  %v1336_v31 = vld [vmem:[#allocation8 + $0x170] ss:$8 sps:$4 sm:$0xff]   ;;  %v1339_v33 = vld [vmem:[#allocation8 + $0x184] ss:$8 sps:$4 sm:$0xff]   ;;  %v1341_v34 = vld [vmem:[#allocation8 + $0x80] ss:$8 sps:$4 sm:$0xff]  }
  0xc3   : > { %856 = vmatprep.subr.bf16.mxu0 %v1309_v13  ;;  %v1342_v35 = vld [vmem:[#allocation8 + $0x180] ss:$8 sps:$4 sm:$0xff]   ;;  %v1343_v36 = vld [vmem:[#allocation8 + $0x94] ss:$8 sps:$4 sm:$0xff]   ;;  %v1347_v38 = vld [vmem:[#allocation8 + $0x90] ss:$8 sps:$4 sm:$0xff]  }
  0xc4   : > { %v1345_v37 = vld [vmem:[#allocation8 + $0x194] ss:$8 sps:$4 sm:$0xff]   ;;  %v1348_v39 = vld [vmem:[#allocation8 + $0x190] ss:$8 sps:$4 sm:$0xff]   ;;  %v1349_v40 = vld [vmem:[#allocation8 + $0xa4] ss:$8 sps:$4 sm:$0xff]  }
  0xc5   : > { %804 = vmatpush1.bf16.msra.mxu1 %v1311_v14  ;;  %v1351_v41 = vld [vmem:[#allocation8 + $0x1a4] ss:$8 sps:$4 sm:$0xff]   ;;  %p337_p9 = scmp.lt.s32.totalorder %s1714_s25, 3  ;;  %v1353_v42 = vld [vmem:[#allocation8 + $0xa0] ss:$8 sps:$4 sm:$0xff]   ;;  %p334_p11 = scmp.gt.s32.totalorder %s1714_s25, 0 }
  0xc6   : > { %857 = vmatpush1.bf16.msra.mxu0 %v1312_v15  ;;  %805 = vmatprep.subr.bf16.mxu1 %v1313_v16  ;;  %v1354_v43 = vld [vmem:[#allocation8 + $0x1a0] ss:$8 sps:$4 sm:$0xff]   ;;  %v1355_v44 = vld [vmem:[#allocation8 + $0xb4] ss:$8 sps:$4 sm:$0xff]   ;;  %v1359_v49 = vld [vmem:[#allocation8 + $0xb0] ss:$8 sps:$4 sm:$0xff]  }
  0xc7   : > { %858 = vmatprep.subr.bf16.mxu0 %v1315_v17  ;;  %v1357_v45 = vld [vmem:[#allocation8 + $0x1b4] ss:$8 sps:$4 sm:$0xff]   ;;  %s2002_s6 = scalar_select %p337_p9, 1, 0  ;;  %v2005_v47 = vld [vmem:[%s1979_s1 + $0x10] sm:$0xff]  ;;  %vm380_vm0 = vcmask 1043456  }
  0xc8   : > { %v2000_v46 = vld [vmem:[%s1979_s1] sm:$0xff]  ;;  %v358_v52 = vpack.c.bf16 %v2005_v47, %v2005_v47  ;;  %v1361_v54 = vld [vmem:[#allocation8 + $0xc4] ss:$8 sps:$4 sm:$0xff]   ;;  %s335_s29 = scalar_select %p334_p11, 1, 0  ;;  %v349_v8 = vld [vmem:[%s1979_s1 + $0x8] sm:$0xff] }
  0xc9   : > { %806 = vmatpush1.bf16.msra.mxu1 %v1317_v18  ;;  %v2008_v48 = vld [vmem:[%s1979_s1 + $0x20] sm:$0xff]  ;;  %v356_v51 = vpack.c.bf16 %v2000_v46, %v2000_v46  ;;  %v1363_v55 = vld [vmem:[#allocation8 + $0x1c4] ss:$8 sps:$4 sm:$0xff]   ;;  %s339_s3 = scvt.s32.f32 %s2002_s6  ;;  %v1365_v58 = vld [vmem:[#allocation8 + $0xc0] ss:$8 sps:$4 sm:$0xff]   ;;  %v357_v15 = vpack.c.bf16 %v349_v8, %v349_v8  ;;  %s323_s11 = scalar_lea.vmem [#allocation10], %s1976_s27 }
  0xca   : > { %859 = vmatpush1.bf16.msra.mxu0 %v1318_v19  ;;  %807 = vmatprep.subr.bf16.mxu1 %v1319_v20  ;;  %v1360_v50 = vld [vmem:[#allocation8 + $0x1b0] ss:$8 sps:$4 sm:$0xff]   ;;  %v2016_v53 = vpack.c.bf16 %v2008_v48, %v2008_v48  ;;  %v369_v56 = vrot.slane %v358_v52, 4  ;;  %v1366_v59 = vld [vmem:[#allocation8 + $0x1c0] ss:$8 sps:$4 sm:$0xff]   ;;  %s336_s15 = scvt.s32.f32 %s335_s29  ;;  %s1161_s14 = sshll.u32 %s1714_s25, 10 }
  0xcb   : > { %860 = vmatprep.subr.bf16.mxu0 %v1321_v21  ;;  %v1367_v62 = vld [vmem:[#allocation8 + $0xd4] ss:$8 sps:$4 sm:$0xff]   ;;  %v345_v1 = vstv %s339_s3  ;;  %v1371_v2 = vld [vmem:[#allocation8 + $0xd0] ss:$8 sps:$4 sm:$0xff]   ;;  %v1373_v4 = vld [vmem:[#allocation8 + $0xe4] ss:$8 sps:$4 sm:$0xff]   ;;  %s2058_s10 = scalar_lea.hbm %s2124_s4, %s1161_s14 }
  0xcc   : > { %v371_v57 = vrot.slane %v2016_v53, 4  ;;  %v387_v60 = vsel %vm380_vm0, %v356_v51, %v369_v56  ;;  %v1369_v63 = vld [vmem:[#allocation8 + $0x1d4] ss:$8 sps:$4 sm:$0xff]   ;;  %v1372_v3 = vld [vmem:[#allocation8 + $0x1d0] ss:$8 sps:$4 sm:$0xff]   ;;  %v340_v6 = vld [vmem:[%s267_s8] sm:$0xff]  ;;  %v341_v7 = vstv %s336_s15 }
  0xcd   : > { %808 = vmatpush1.bf16.msra.mxu1 %v1323_v22  ;;  %829 = vmatprep.mubr.bf16.mxu1 %v387_v60  ;;  %v344_v0 = vld [vmem:[%s285_s5] sm:$0xff]  ;;  %v1375_v5 = vld [vmem:[#allocation8 + $0x1e4] ss:$8 sps:$4 sm:$0xff]   ;;  %v1377_v12 = vld [vmem:[#allocation8 + $0xe0] ss:$8 sps:$4 sm:$0xff]   ;;  %v342_v14 = vmul.f32 %v341_v7, %v340_v6  ;;  %s934_s30 = sshll.u32 %s323_s11, 4  ;;  %s2060_s30 = int_to_ptr.vmem [resolvable:$true] %s934_s30 }
  0xce   : > { %861 = vmatpush1.bf16.msra.mxu0 %v1324_v23  ;;  %809 = vmatprep.subr.bf16.mxu1 %v1325_v24  ;;  %v395_v61 = vsel %vm380_vm0, %v358_v52, %v371_v57  ;;  %v2030_v9 = vld [vmem:[%s1979_s1 + $0x18] sm:$0xff]  ;;  %v346_v10 = vmul.f32 %v345_v1, %v344_v0  ;;  %v2033_v11 = vld [vmem:[%s1979_s1 + $0x30] sm:$0xff]  ;;  %v1379_v17 = vld [vmem:[#allocation8 + $0xf4] ss:$8 sps:$4 sm:$0xff]   ;;  %v368_v24 = vrot.slane %v357_v15, 4  ;;  %s920_s25 = scalar_lea.sflag [#allocation4], %s274_s12 }
  0xcf   : > { %862 = vmatprep.subr.bf16.mxu0 %v1327_v25  ;;  %882 = vmatprep.mubr.bf16.mxu0 %v395_v61  ;;  %v1378_v13 = vld [vmem:[#allocation8 + $0x1e0] ss:$8 sps:$4 sm:$0xff]   ;;  %v359_v16 = vpack.c.bf16 %v2030_v9, %v2030_v9  ;;  %v1381_v18 = vld [vmem:[#allocation8 + $0x1f4] ss:$8 sps:$4 sm:$0xff]   ;;  %v362_v19 = vpack.c.bf16 %v2033_v11, %v2033_v11  ;;  %v1383_v21 = vld [vmem:[#allocation8 + $0xf0] ss:$8 sps:$4 sm:$0xff]   ;;  %v343_v23 = vpack.c.bf16 %v342_v14, %v342_v14 }
  0xd0   : > { %v347_v20 = vpack.c.bf16 %v346_v10, %v346_v10  ;;  %v1384_v22 = vld [vmem:[#allocation8 + $0x1f0] ss:$8 sps:$4 sm:$0xff]   ;;  %s1503_s27 = scalar_lea.vmem %s2060_s30, 1024  ;;  %p2172_p0 = scmp.ne.s32.totalorder %s2144_s7, 0 }
  0xd1   : > { %810 = vmatpush1.bf16.msra.mxu1 %v1329_v26  ;;  %v370_v25 = vrot.slane %v359_v16, 4  ;;  %v353_v26 = vld [vmem:[%s1979_s1 + $0x28] sm:$0xff]  ;;  %p1504_p1 = scmp.ne.s32.totalorder %s2060_s30, %s1503_s27  ;;  %s1637_s21 = smov [#allocation10]  }
  0xd2   : > { %863 = vmatpush1.bf16.msra.mxu0 %v1330_v27  ;;  %811 = vmatprep.subr.bf16.mxu1 %v1331_v28  ;;  %v377_v27 = vrot.slane %v362_v19, 4  ;;  %v379_v28 = vrot.slane %v347_v20, 4 }
  0xd3   : > { %864 = vmatprep.subr.bf16.mxu0 %v1333_v29  ;;  %v355_v29 = vld [vmem:[%s1979_s1 + $0x38] sm:$0xff]  ;;  %p1505_p6 = pnand %p1504_p1, %p2172_p0  ;;  %s1507_s1 = sshll.u32 %s1637_s21, 4  ;;  %s1508_s1 = int_to_ptr.vmem [resolvable:$false] %s1507_s1 }
  0xd4   : > { %s1509_s9 = scalar_lea.vmem %s1508_s1, 2048  ;;  %p1510_p5 = scmp.lt.s32.totalorder %s2060_s30, %s1508_s1 }
  0xd5   : > { %812 = vmatpush1.bf16.msra.mxu1 %v1335_v30  ;;  %v361_v30 = vpack.c.bf16 %v353_v26, %v353_v26  ;;  %p1506_p8 = pneg %p1505_p6  ;;  %p1511_p10 = scmp.lt.s32.totalorder %s1509_s9, %s1503_s27 }
  0xd6   : > { %865 = vmatpush1.bf16.msra.mxu0 %v1336_v31  ;;  %813 = vmatprep.subr.bf16.mxu1 %v1337_v32  ;;  %v383_v31 = vsel %vm380_vm0, %v343_v23, %v368_v24  ;;  %v391_v32 = vsel %vm380_vm0, %v357_v15, %v370_v25 }
  0xd7   : > { %866 = vmatprep.subr.bf16.mxu0 %v1339_v33  ;;  %v363_v33 = vpack.c.bf16 %v355_v29, %v355_v29  ;;  %p1512_p2 = por %p1511_p10, %p1510_p5 }
  0xd9   : > { %814 = vmatpush1.bf16.msra.mxu1 %v1341_v34  ;;  %v403_v34 = vsel %vm380_vm0, %v2016_v53, %v377_v27  ;;  %p1513_p4 = pnand %p1512_p2, %p1506_p8 }
  0xda   : > { %867 = vmatpush1.bf16.msra.mxu0 %v1342_v35  ;;  %815 = vmatprep.subr.bf16.mxu1 %v1343_v36  ;;  %v411_v35 = vsel %vm380_vm0, %v362_v19, %v379_v28  ;;  %v376_v36 = vrot.slane %v361_v30, 4 }
  0xdb   : > { %868 = vmatprep.subr.bf16.mxu0 %v1345_v37  ;;  %v378_v37 = vrot.slane %v363_v33, 4 }
  0xdd   : > { %816 = vmatpush1.bf16.msra.mxu1 %v1347_v38  ;;  %v399_v38 = vsel %vm380_vm0, %v359_v16, %v376_v36 }
  0xde   : > { %869 = vmatpush1.bf16.msra.mxu0 %v1348_v39  ;;  %817 = vmatprep.subr.bf16.mxu1 %v1349_v40  ;;  %v407_v39 = vsel %vm380_vm0, %v361_v30, %v378_v37 }
  0xdf   : > { %870 = vmatprep.subr.bf16.mxu0 %v1351_v41 }
  0xe1   : > { %818 = vmatpush1.bf16.msra.mxu1 %v1353_v42 }
  0xe2   : > { %871 = vmatpush1.bf16.msra.mxu0 %v1354_v43  ;;  %819 = vmatprep.subr.bf16.mxu1 %v1355_v44 }
  0xe3   : > { %872 = vmatprep.subr.bf16.mxu0 %v1357_v45 }
  0xe5   : > { %820 = vmatpush1.bf16.msra.mxu1 %v1359_v49 }
  0xe6   : > { %873 = vmatpush1.bf16.msra.mxu0 %v1360_v50  ;;  %821 = vmatprep.subr.bf16.mxu1 %v1361_v54 }
  0xe7   : > { %874 = vmatprep.subr.bf16.mxu0 %v1363_v55 }
  0xe9   : > { %822 = vmatpush1.bf16.msra.mxu1 %v1365_v58 }
  0xea   : > { %875 = vmatpush1.bf16.msra.mxu0 %v1366_v59  ;;  %823 = vmatprep.subr.bf16.mxu1 %v1367_v62 }
  0xeb   : > { %876 = vmatprep.subr.bf16.mxu0 %v1369_v63 }
  0xed   : > { %824 = vmatpush1.bf16.msra.mxu1 %v1371_v2 }
  0xee   : > { %877 = vmatpush1.bf16.msra.mxu0 %v1372_v3  ;;  %825 = vmatprep.subr.bf16.mxu1 %v1373_v4 }
  0xef   : > { %878 = vmatprep.subr.bf16.mxu0 %v1375_v5 }
  0xf1   : > { %826 = vmatpush1.bf16.msra.mxu1 %v1377_v12 }
  0xf2   : > { %879 = vmatpush1.bf16.msra.mxu0 %v1378_v13  ;;  %827 = vmatprep.subr.bf16.mxu1 %v1379_v17 }
  0xf3   : > { %880 = vmatprep.subr.bf16.mxu0 %v1381_v18 }
  0xf5   : > { %828 = vmatpush1.bf16.msra.mxu1 %v1383_v21 }
  0xf6   : > { %881 = vmatpush1.bf16.msra.mxu0 %v1384_v22 }
  0xf8   : > { %830 = vmatmul.mubr.bf16.vlgmr.msra.gmra.mrb[0].mxu1 %v383_v31 }
  0xf9   : > { %883 = vmatmul.mubr.bf16.vlgmr.msra.gmra.mrb[0].mxu0 %v391_v32  ;;  %839 = vmatprep.mubr.bf16.mxu1 %v403_v34 }
  0xfa   : > { %892 = vmatprep.mubr.bf16.mxu0 %v411_v35 }
 0x100   : > { %840 = vmatmul.mubr.bf16.gmra.mrb[4].mxu1 %v399_v38 }
 0x101   : > { %893 = vmatmul.mubr.bf16.gmra.mrb[4].mxu0 %v407_v39 }
 0x1cb   : > { %v831_v40 = vpop.f32.mrb[0].mxu1 }
 0x1cc   : > { %v884_v41 = vpop.f32.mrb[0].mxu0  ;;  %v833_v43 = vpop.f32.mrb[1].mxu1 }
 0x1cd   : > { %v885_v42 = vadd.f32 %v884_v41, %v831_v40  ;;  %v886_v44 = vpop.f32.mrb[1].mxu0  ;;  %v835_v49 = vpop.f32.mrb[2].mxu1 }
 0x1ce   : > { %v887_v45 = vadd.f32 %v886_v44, %v833_v43  ;;  %v888_v50 = vpop.f32.mrb[2].mxu0  ;;  %v837_v53 = vpop.f32.mrb[3].mxu1 }
 0x1cf   : > { %v903_v51 = vadd.f32 %v885_v42, %v2000_v46  ;;  %v889_v52 = vadd.f32 %v888_v50, %v835_v49  ;;  %v890_v54 = vpop.f32.mrb[3].mxu0 }
 0x1d0   : > { %v904_v55 = vadd.f32 %v887_v45, %v349_v8  ;;  %v891_v56 = vadd.f32 %v890_v54, %v837_v53 }
 0x1d1   : > { %905 = vst [vmem:[%s323_s11] sm:$0xff] %v903_v51  ;;  %v907_v57 = vadd.f32 %v889_v52, %v2005_v47 }
 0x1d2   : > { %906 = vst [vmem:[%s323_s11 + $0x8] sm:$0xff] %v904_v55  ;;  %v908_v58 = vadd.f32 %v891_v56, %v2030_v9 }
 0x1d3   : > { %909 = vst [vmem:[%s323_s11 + $0x10] sm:$0xff] %v907_v57  ;;  %v841_v59 = vpop.f32.mrb[4].mxu1 }
 0x1d4   : > { %910 = vst [vmem:[%s323_s11 + $0x18] sm:$0xff] %v908_v58  ;;  %v894_v60 = vpop.f32.mrb[4].mxu0  ;;  %v843_v62 = vpop.f32.mrb[5].mxu1 }
 0x1d5   : > { %v895_v61 = vadd.f32 %v894_v60, %v841_v59  ;;  %v896_v46 = vpop.f32.mrb[5].mxu0  ;;  %v845_v0 = vpop.f32.mrb[6].mxu1 }
 0x1d6   : > { %v897_v63 = vadd.f32 %v896_v46, %v843_v62  ;;  %v898_v1 = vpop.f32.mrb[6].mxu0  ;;  %v847_v4 = vpop.f32.mrb[7].mxu1 }
 0x1d7   : > { %v911_v2 = vadd.f32 %v895_v61, %v2008_v48  ;;  %v899_v3 = vadd.f32 %v898_v1, %v845_v0  ;;  %v900_v47 = vpop.f32.mrb[7].mxu0 }
 0x1d8   : > { %v912_v5 = vadd.f32 %v897_v63, %v353_v26  ;;  %v901_v6 = vadd.f32 %v900_v47, %v847_v4 }
 0x1d9   : > { %913 = vst [vmem:[%s323_s11 + $0x20] sm:$0xff] %v911_v2  ;;  %v915_v7 = vadd.f32 %v899_v3, %v2033_v11 }
 0x1da   : > { %914 = vst [vmem:[%s323_s11 + $0x28] sm:$0xff] %v912_v5  ;;  %v916_v8 = vadd.f32 %v901_v6, %v355_v29 }
 0x1db   : > { %917 = vst [vmem:[%s323_s11 + $0x30] sm:$0xff] %v915_v7 }
 0x1dc   : > { %918 = vst [vmem:[%s323_s11 + $0x38] sm:$0xff] %v916_v8 }
 0x1dd   : > { %1516 = shalt.err (!%p1513_p4)
}
 0x1de   : > { %s1517_s12 = scalar_lea.hbm %s2058_s10, 1024  ;;  %s1521_s6 = scalar_lea.hbm %s2124_s4, 4096 }
 0x1df   : > { %p1518_p12 = scmp.ne.s32.totalorder %s2058_s10, %s1517_s12  ;;  %p1522_p7 = scmp.lt.u32.totalorder %s2058_s10, %s2124_s4 }
 0x1e0   : > { %p1523_p9 = scmp.lt.u32.totalorder %s1521_s6, %s1517_s12  ;;  %p1525_p1 = scmp.lt.u32.totalorder %s1517_s12, %s2058_s10 }
 0x1e1   : > { %p1519_p13 = pnand %p1518_p12, %p2172_p0 }
 0x1e2   : > { %p1524_p11 = por %p1523_p9, %p1522_p7 }
 0x1e3   : > { %p1520_p3 = pneg %p1519_p13 }
 0x1e4   : > { %p1526_p6 = por %p1525_p1, %p1524_p11 }
 0x1e6   : > { %p1527_p8 = pnand %p1526_p6, %p1520_p3 }
 0x1e8   : > { %1530 = shalt.err (!%p1527_p8)
}
 0x1e9   : > { %1182 = dma.vmem_to_hbm [thread:$0]  (%p2172_p0), %s2060_s30, 1024, %s2058_s10, %s920_s25  }
 0x1ea PF: > { %s2173_s15 = sld [smem:[#allocation19_spill]]  ;;  %p1205_p5 = scmp.ge.s32.totalorder %s1629_s24, 2 }
 0x1eb   : > { %s946_s11 = sand.u32 1, %s1605_s18  }
 0x1ec   : > { %s947_s14 = scalar_lea.sflag [#allocation4], %s946_s11 }
 0x1f0   : > { %p2174_p10 = scmp.ne.s32.totalorder %s2173_s15, 0 }
 0x1f2   : > { %p1199_p2 = pnand %p1205_p5, %p2174_p10 }
 0x1f4   : > { %1588 = dma.done.wait (!%p1199_p2), %s947_s14, 1024  }
 0x1f5   : > { %1590 = vsyncadd (!%p1199_p2), %s947_s14, 4294966272  ;;  %s2175_s24 = sld [smem:[#allocation17_spill]]  ;;  %s2176_s7 = sld [smem:[#allocation16_spill]] }
 0x1f6   : > { %s2177_s20 = sld [smem:[#allocation18_spill]]  ;;  %s2178_s15 = smov %s1597_s16 }
 0x1f7   : > { %s2179_s16 = smov %s1601_s17  ;;  %s2180_s17 = smov %s1921_s26 }
 0x1f8   : > { %s2181_s18 = smov %s1609_s19  ;;  %s2183_s21 = smov %s1621_s22 }
 0x1f9   : > { %s2184_s22 = smov %s1625_s23  ;;  %s2185_s23 = smov %s1859_s28 }
 0x1fb   : > { %p21_p0 = scmp.ge.s32.totalorder %s2175_s24, 6   ;;  %s2182_s19 = smov %s2176_s7 }
 0x1fd   :  { %23 = sbr.rel (!%p21_p0) target bundleno = 14 (0xe), region = 109 }
 0x204   :  { %952 = vsyncpa [#allocation3], 1 }
 0x205   :  { %954 = vsyncpa [#allocation3 + $0x1], 1 }
 0x206   :  { %955 = vsyncpa [#allocation6], 1 }
 0x207   :  { %957 = vsyncpa [#allocation6 + $0x1], 1 }
 0x208   :  { %958 = vsyncpa [#allocation9], 1 }
 0x209   :  { %959 = vsyncpa [#allocation4], 1 }
 0x20a   :  { %961 = vsyncpa [#allocation4 + $0x1], 1 }

// kernel: tpu_custom_call.1
= control target key start
LH: loop header
LB: loop body
LE: loop exit
PB: predicated region body
PF: predicated region fallthrough
CT: control target
= control target key end

     0   :  { %s2120_s0 = inlined_call_operand.hbm [shape: f32[8,4096], index: 0, kind: input, shape index: {}]   ;;  %s2121_s1 = inlined_call_operand.hbm [shape: f32[8,4096], index: 1, kind: input, shape index: {}]   ;;  %s2122_s2 = inlined_call_operand.hbm [shape: f32[8,4096], index: 2, kind: input, shape index: {}]   ;;  %s2123_s3 = inlined_call_operand.hbm [shape: bf16[512,256], index: 3, kind: input, shape index: {}]   ;;  %s2124_s4 = inlined_call_operand.hbm [shape: f32[8,4096], index: 4, kind: output, shape index: {}]  }
   0x1   :  { %2137 = sst [smem:[#allocation20_spill]] %s2121_s1 }
   0x2   :  { %2138 = sst [smem:[#allocation21_spill]] %s2123_s3 }
   0x3   :  { %9 = vsyncpa [#allocation3], 0 }
   0x4   :  { %11 = vsyncpa [#allocation3 + $0x1], 0 }
   0x5   :  { %12 = vsyncpa [#allocation6], 0 }
   0x6   :  { %14 = vsyncpa [#allocation6 + $0x1], 0 }
   0x7   :  { %15 = vsyncpa [#allocation9], 0 }
   0x8   :  { %16 = vsyncpa [#allocation4], 0 }
   0x9   :  { %18 = vsyncpa [#allocation4 + $0x1], 0  ;;  %s1663_s15 = smov 0   ;;  %s1665_s16 = smov 0  }
   0xa   :  { %s1667_s17 = smov 0   ;;  %s1669_s18 = smov 0  }
   0xb   :  { %s1671_s19 = smov 0   ;;  %s1673_s20 = smov 0  }
   0xc   :  { %s1675_s21 = smov 0   ;;  %s1677_s22 = smov 0  }
   0xd   :  { %s1679_s23 = smov 0   ;;  %s1681_s24 = smov 0  }
   0xe LB: > { %2139 = sst [smem:[#allocation16_spill]] %s1613_s20  ;;  %s1714_s25 = sadd.s32 4294967295, %s1629_s24   ;;  %s1629_s24 = sphi %s1681_s24, %s2175_s24   ;;  %s1625_s23 = sphi %s1679_s23, %s2185_s23   ;;  %s1621_s22 = sphi %s1677_s22, %s2184_s22   ;;  %s1617_s21 = sphi %s1675_s21, %s2183_s21   ;;  %s1613_s20 = sphi %s1673_s20, %s2177_s20   ;;  %s1609_s19 = sphi %s1671_s19, %s2182_s19   ;;  %s1605_s18 = sphi %s1669_s18, %s2181_s18   ;;  %s1601_s17 = sphi %s1667_s17, %s2180_s17   ;;  %s1597_s16 = sphi %s1665_s16, %s2179_s16   ;;  %s1593_s15 = sphi %s1663_s15, %s2178_s15  }
   0xf   : > { %s1057_s26 = sadd.s32 4294967294, %s1629_s24   ;;  %s1718_s27 = sadd.s32 1, %s1629_s24  }
  0x10   : > { %2140 = sst [smem:[#allocation17_spill]] %s1718_s27  ;;  %p2126_p0 = scmp.eq.s32.totalorder %s1629_s24, 0 }
  0x11   : > { %p2127_p1 = scmp.eq.s32.totalorder %s1714_s25, 0  ;;  %s62_s28 = ssub.s32 %s1629_s24, %s1718_s27 }
  0x12   : > { %p63_p2 = scmp.eq.s32.totalorder %s62_s28, 0  ;;  %s65_s29 = sadd.s32 1, %s1613_s20 }
  0x13   : > { %p72_p3 = scmp.ne.s32.totalorder %s1613_s20, %s1609_s19  ;;  %p78_p4 = scmp.ne.s32.totalorder %s1609_s19, %s1605_s18 }
  0x14   : > { %s1730_s30 = scalar_select %p63_p2, %s1613_s20, %s65_s29  }
  0x15   : > { %p1734_p5 = por %p72_p3, %p2126_p0  ;;  %p1740_p6 = por %p78_p4, %p2127_p1 }
  0x16   : > { %2141 = sst [smem:[#allocation18_spill]] %s1730_s30  ;;  %p157_p7 = scmp.eq.s32.totalorder %s1714_s25, 3 }
  0x17   : > { %s2143_s6 = scalar_select %p1740_p6, 1, 0 }
  0x18   : > { %p163_p8 = scmp.eq.s32.totalorder %s1057_s26, 3  ;;  %p1745_p9 = por %p157_p7, %p72_p3 }
  0x19   : > { %p2125_p11 = scmp.lt.s32.totalorder %s1629_s24, 4  ;;  %s218_s9 = sand.u32 1, %s1629_s24  }
  0x1a   : > { %s2144_s7 = scalar_select %p1745_p9, 1, 0 }
  0x1b   : > { %p1749_p10 = por %p163_p8, %p78_p4  ;;  %s220_s10 = sand.u32 1, %s1613_s20  }
  0x1c   : > { %s1071_s11 = sshll.u32 %s220_s10, 6  ;;  %s1158_s12 = sshll.u32 %s1629_s24, 10 }
  0x1d   : > { %s2145_s8 = scalar_select %p1749_p10, 1, 0 }
  0x1e   : > { %s2147_s1 = sld [smem:[#allocation20_spill]]  ;;  %s222_s26 = scalar_lea.vmem [#allocation5], %s1071_s11 }
  0x1f   : > { %2146 = sst [smem:[#allocation19_spill]] %s2145_s8  ;;  %s230_s29 = sshll.u32 %s222_s26, 4  ;;  %s1770_s29 = int_to_ptr.vmem [resolvable:$true] %s230_s29 }
  0x20   : > { %p1766_p12 = pnand %p2125_p11, %p1734_p5  ;;  %s1774_s10 = scalar_lea.sflag [#allocation6], %s218_s9 }
  0x22   : > { %p1387_p4 = pneg %p1766_p12 }
  0x24   : > { %s1760_s28 = scalar_lea.hbm %s2147_s1, %s1158_s12  ;;  %s1390_s13 = scalar_lea.hbm %s2147_s1, 4096 }
  0x25   : > { %s1385_s12 = scalar_lea.hbm %s1760_s28, 1024  ;;  %p1391_p5 = scmp.lt.u32.totalorder %s1760_s28, %s2147_s1 }
  0x26   : > { %p1386_p3 = scmp.ne.s32.totalorder %s1760_s28, %s1385_s12  ;;  %p1392_p11 = scmp.lt.u32.totalorder %s1390_s13, %s1385_s12 }
  0x27   : > { %p1394_p1 = scmp.lt.u32.totalorder %s1385_s12, %s1760_s28 }
  0x28   : > { %p1388_p7 = pnand %p1387_p4, %p1386_p3  ;;  %p1393_p0 = por %p1392_p11, %p1391_p5 }
  0x2a   : > { %p1389_p8 = pneg %p1388_p7  ;;  %p1395_p13 = por %p1394_p1, %p1393_p0 }
  0x2c   : > { %p1396_p2 = pnand %p1395_p13, %p1389_p8 }
  0x2e   : > { %1399 = shalt.err (!%p1396_p2)
}
  0x2f   : > { %s1400_s9 = scalar_lea.vmem %s1770_s29, 1024  ;;  %s1631_s5 = smov [#allocation5]  }
  0x30   : > { %p1401_p3 = scmp.ne.s32.totalorder %s1770_s29, %s1400_s9  ;;  %s1405_s11 = sshll.u32 %s1631_s5, 4  ;;  %s1406_s11 = int_to_ptr.vmem [resolvable:$false] %s1405_s11 }
  0x31   : > { %s1407_s14 = scalar_lea.vmem %s1406_s11, 2048  ;;  %p1408_p9 = scmp.lt.s32.totalorder %s1770_s29, %s1406_s11 }
  0x32   : > { %p1403_p7 = pnand %p1401_p3, %p1387_p4  ;;  %p1409_p11 = scmp.lt.s32.totalorder %s1407_s14, %s1400_s9 }
  0x34   : > { %p1404_p10 = pneg %p1403_p7  ;;  %p1410_p5 = por %p1409_p11, %p1408_p9 }
  0x36   : > { %p1411_p0 = pnand %p1410_p5, %p1404_p10 }
  0x38   : > { %1414 = shalt.err (!%p1411_p0)
}
  0x39   : > { %1194 = dma.hbm_to_vmem [thread:$0]  (!%p1766_p12), %s1760_s28, 1024, %s1770_s29, %s1774_s10  }
  0x3a   : > { %p2149_p1 = scmp.lt.s32.totalorder %s1629_s24, 5  ;;  %p2150_p13 = scmp.ge.s32.totalorder %s1629_s24, 1 }
  0x3b   : > { %s1632_s13 = smov [#allocation8]   ;;  %p2152_p10 = scmp.eq.s32.totalorder %s1714_s25, 0 }
  0x3c   : > { %p1806_p2 = pnand %p2150_p13, %p2149_p1  ;;  %s182_s26 = sshll.u32 %s1632_s13, 4  ;;  %s183_s26 = int_to_ptr.vmem [resolvable:$true] %s182_s26 }
  0x3d   : > { %s2154_s3 = sld [smem:[#allocation21_spill]] }
  0x3e   : > { %s2151_s12 = scalar_select %p1806_p2, 1, 0 }
  0x3f   : > { %p1184_p9 = pneg %p1806_p2 }
  0x41   : > { %p1814_p4 = pnand %p1184_p9, %p2152_p10 }
  0x43   : > { %s1415_s28 = scalar_lea.hbm %s2154_s3, 8192  ;;  %p1417_p8 = pneg %p1814_p4 }
  0x44   : > { %p1416_p12 = scmp.ne.s32.totalorder %s2154_s3, %s1415_s28  ;;  %p1422_p11 = scmp.lt.u32.totalorder %s1415_s28, %s2154_s3 }
  0x46   : > { %p1418_p3 = pnand %p1417_p8, %p1416_p12 }
  0x48   : > { %p1419_p7 = pneg %p1418_p3 }
  0x4a   : > { %p1424_p5 = pnand %p1422_p11, %p1419_p7 }
  0x4c   : > { %1427 = shalt.err (!%p1424_p5)
}
  0x4d   : > { %s1428_s1 = scalar_lea.vmem %s183_s26, 8192  ;;  %p1436_p9 = scmp.lt.s32.totalorder %s183_s26, %s183_s26 }
  0x4e   : > { %p1429_p0 = scmp.ne.s32.totalorder %s183_s26, %s1428_s1  ;;  %p1437_p10 = scmp.lt.s32.totalorder %s1428_s1, %s1428_s1 }
  0x50   : > { %p1431_p1 = pnand %p1429_p0, %p1417_p8  ;;  %p1438_p6 = por %p1437_p10, %p1436_p9 }
  0x52   : > { %p1432_p13 = pneg %p1431_p1 }
  0x54   : > { %p1439_p2 = pnand %p1438_p6, %p1432_p13 }
  0x56   : > { %1442 = shalt.err (!%p1439_p2)
}
  0x57   : > { %s1633_s9 = smov 128   ;;  %s1634_s5 = smov 8  }
  0x58   : > { %1187 = dma.hbm_to_vmem [thread:$0]  (!%p1814_p4), %s2154_s3, 8192, %s183_s26, [#allocation9], %s1633_s9, %s1633_s9, %s1634_s5  }
  0x59   : > { %s1058_s1 = sshll.u32 %s1629_s24, 3  ;;  %s39_s20 = sadd.s32 1, %s1625_s23 }
  0x5a   : > { %s1059_s11 = sadd.s32 4294967295, %s1058_s1  ;;  %s1835_s14 = sadd.s32 8, %s1058_s1 }
  0x5b   : > { %p30_p6 = scmp.gt.s32.totalorder %s1059_s11, 0  ;;  %s1061_s13 = sadd.s32 4294967295, %s1835_s14 }
  0x5c   : > { %p34_p2 = scmp.gt.s32.totalorder %s1061_s13, 0  ;;  %p46_p12 = scmp.ne.s32.totalorder %s1625_s23, %s1621_s22 }
  0x5d   : > { %s2187_s11 = smov (!%p30_p6, %s1059_s11), 0  ;;  %p52_p8 = scmp.ne.s32.totalorder %s1621_s22, %s1617_s21 }
  0x5e   : > { %s2189_s13 = smov (!%p34_p2, %s1061_s13), 0  ;;  %s2135_s30 = sadd.s32 8, %s1835_s14 }
  0x5f   : > { %s36_s26 = ssub.s32 %s2187_s11, %s2189_s13  ;;  %p2155_p3 = scmp.eq.s32.totalorder %s1629_s24, 0 }
  0x60   : > { %p37_p4 = scmp.eq.s32.totalorder %s36_s26, 0  ;;  %p2156_p11 = scmp.eq.s32.totalorder %s1714_s25, 0 }
  0x61   : > { %p48_p7 = por %p2155_p3, %p46_p12  ;;  %p1854_p0 = scmp.lt.s32.totalorder %s2135_s30, 31 }
  0x62   : > { %p1848_p5 = por %p2156_p11, %p52_p8  ;;  %s196_s29 = sand.u32 1, %s1625_s23  }
  0x63   : > { %s1859_s28 = scalar_select %p37_p4, %s1625_s23, %s39_s20  }
  0x64   : > { %s2157_s9 = scalar_select %p1848_p5, 1, 0 }
  0x65   : > { %s1070_s1 = sshll.u32 %s2187_s11, 7  ;;  %s1067_s21 = sshll.u32 %s196_s29, 3 }
  0x66   : > { %s1865_s26 = scalar_lea.hbm %s2120_s0, %s1070_s1  ;;  %s200_s27 = scalar_lea.vmem [#allocation2], %s1067_s21 }
  0x67   : > { %s211_s8 = sshll.u32 %s200_s27, 4  ;;  %p2159_p1 = scmp.lt.s32.totalorder %s1629_s24, 4  ;;  %s1873_s8 = int_to_ptr.vmem [resolvable:$true] %s211_s8 }
  0x68   : > { %s197_s20 = scalar_lea.sflag [#allocation3], %s196_s29  ;;  %s1443_s11 = scalar_lea.hbm %s1865_s26, 128 }
  0x69   : > { %p1869_p13 = pnand %p2159_p1, %p48_p7  ;;  %p1444_p9 = scmp.ne.s32.totalorder %s1865_s26, %s1443_s11 }
  0x6a   : > { %s1448_s1 = scalar_lea.hbm %s2120_s0, 4096  ;;  %p1449_p12 = scmp.lt.u32.totalorder %s1865_s26, %s2120_s0 }
  0x6b   : > { %p1445_p10 = pneg %p1869_p13  ;;  %p1450_p8 = scmp.lt.u32.totalorder %s1448_s1, %s1443_s11 }
  0x6c   : > { %p1452_p3 = scmp.lt.u32.totalorder %s1443_s11, %s1865_s26 }
  0x6d   : > { %p1446_p6 = pnand %p1445_p10, %p1444_p9  ;;  %p1451_p4 = por %p1450_p8, %p1449_p12 }
  0x6f   : > { %p1447_p2 = pneg %p1446_p6  ;;  %p1453_p7 = por %p1452_p3, %p1451_p4 }
  0x71   : > { %p1454_p11 = pnand %p1453_p7, %p1447_p2 }
  0x73   : > { %1457 = shalt.err (!%p1454_p11)
}
  0x74   : > { %s1458_s29 = scalar_lea.vmem %s1873_s8, 128  ;;  %s1635_s3 = smov [#allocation2]  }
  0x75   : > { %p1459_p1 = scmp.ne.s32.totalorder %s1873_s8, %s1458_s29  ;;  %s1463_s27 = sshll.u32 %s1635_s3, 4  ;;  %s1464_s27 = int_to_ptr.vmem [resolvable:$false] %s1463_s27 }
  0x76   : > { %s1465_s21 = scalar_lea.vmem %s1464_s27, 256  ;;  %p1466_p5 = scmp.lt.s32.totalorder %s1873_s8, %s1464_s27 }
  0x77   : > { %p1461_p9 = pnand %p1459_p1, %p1445_p10  ;;  %p1467_p12 = scmp.lt.s32.totalorder %s1465_s21, %s1458_s29 }
  0x79   : > { %p1462_p6 = pneg %p1461_p9  ;;  %p1468_p8 = por %p1467_p12, %p1466_p5 }
  0x7b   : > { %p1469_p4 = pnand %p1468_p8, %p1462_p6 }
  0x7d   : > { %1472 = shalt.err (!%p1469_p4)
}
  0x7e   : > { %1191 = dma.hbm_to_vmem [thread:$0]  (!%p1869_p13), %s1865_s26, 128, %s1873_s8, %s197_s20  }
  0x7f   : > { %p90_p5 = scmp.lt.s32.totalorder %s1835_s14, 31  ;;  %s99_s11 = sadd.s32 1, %s1601_s17 }
  0x80   : > { %s2161_s1 = sadd.s32 8, %s1835_s14  ;;  %p106_p10 = scmp.ne.s32.totalorder %s1601_s17, %s1597_s16 }
  0x81   : > { %s2191_s1 = smov (!%p1854_p0, %s2161_s1), 31  ;;  %s2193_s14 = smov (!%p90_p5, %s1835_s14), 31 }
  0x82   : > { %p112_p2 = scmp.ne.s32.totalorder %s1597_s16, %s1593_s15  ;;  %s96_s30 = ssub.s32 %s2193_s14, %s2191_s1 }
  0x83   : > { %s239_s13 = sand.u32 1, %s1601_s17   ;;  %p97_p3 = scmp.eq.s32.totalorder %s96_s30, 0 }
  0x84   : > { %p2162_p7 = scmp.eq.s32.totalorder %s1629_s24, 0  ;;  %p2163_p1 = scmp.eq.s32.totalorder %s1714_s25, 0 }
  0x85   : > { %s1074_s8 = sshll.u32 %s239_s13, 3  ;;  %s1076_s20 = sshll.u32 %s2193_s14, 7 }
  0x86   : > { %p108_p11 = por %p106_p10, %p2162_p7  ;;  %p1916_p9 = por %p112_p2, %p2163_p1 }
  0x87   : > { %s1921_s26 = scalar_select %p97_p3, %s1601_s17, %s99_s11  }
  0x88   : > { %s1926_s27 = scalar_lea.hbm %s2122_s2, %s1076_s20  ;;  %s241_s15 = scalar_lea.vmem [#allocation7], %s1074_s8 }
  0x89   : > { %s252_s21 = sshll.u32 %s241_s15, 4  ;;  %p2165_p0 = scmp.lt.s32.totalorder %s1629_s24, 4  ;;  %s1928_s21 = int_to_ptr.vmem [resolvable:$true] %s252_s21 }
  0x8a   : > { %s1473_s14 = scalar_lea.hbm %s1926_s27, 128  ;;  %s1478_s13 = scalar_lea.hbm %s2122_s2, 4096 }
  0x8b   : > { %p1932_p13 = pnand %p2165_p0, %p108_p11  ;;  %p1474_p6 = scmp.ne.s32.totalorder %s1926_s27, %s1473_s14 }
  0x8c   : > { %p1479_p5 = scmp.lt.u32.totalorder %s1926_s27, %s2122_s2  ;;  %p1480_p10 = scmp.lt.u32.totalorder %s1478_s13, %s1473_s14 }
  0x8d   : > { %p1475_p12 = pneg %p1932_p13  ;;  %p1482_p3 = scmp.lt.u32.totalorder %s1473_s14, %s1926_s27 }
  0x8e   : > { %p1481_p2 = por %p1480_p10, %p1479_p5 }
  0x8f   : > { %p1476_p8 = pnand %p1475_p12, %p1474_p6 }
  0x90   : > { %p1483_p7 = por %p1482_p3, %p1481_p2 }
  0x91   : > { %p1477_p4 = pneg %p1476_p8 }
  0x93   : > { %p1484_p11 = pnand %p1483_p7, %p1477_p4 }
  0x95   : > { %1487 = shalt.err (!%p1484_p11)
}
  0x96   : > { %s1488_s5 = scalar_lea.vmem %s1928_s21, 128  ;;  %s1636_s3 = smov [#allocation7]  }
  0x97   : > { %p1489_p1 = scmp.ne.s32.totalorder %s1928_s21, %s1488_s5  ;;  %s1493_s15 = sshll.u32 %s1636_s3, 4  ;;  %s1494_s15 = int_to_ptr.vmem [resolvable:$false] %s1493_s15 }
  0x98   : > { %s1495_s11 = scalar_lea.vmem %s1494_s15, 256  ;;  %p1496_p8 = scmp.lt.s32.totalorder %s1928_s21, %s1494_s15 }
  0x99   : > { %p1491_p0 = pnand %p1489_p1, %p1475_p12  ;;  %p1497_p5 = scmp.lt.s32.totalorder %s1495_s11, %s1488_s5 }
  0x9b   : > { %p1492_p6 = pneg %p1491_p0  ;;  %p1498_p10 = por %p1497_p5, %p1496_p8 }
  0x9d   : > { %p1499_p2 = pnand %p1498_p10, %p1492_p6 }
  0x9f   : > { %1502 = shalt.err (!%p1499_p2)
}
  0xa0   : > { %1197 = dma.hbm_to_vmem [thread:$0]  (!%p1932_p13), %s1926_s27, 128, %s1928_s21, %s1774_s10  }
  0xa1   : > { %p2167_p4 = scmp.ne.s32.totalorder %s2151_s12, 0 }
  0xa2   : > { %s263_s14 = sand.u32 (!%p2167_p4), 1, %s1621_s22   ;;  %p2168_p12 = scmp.ne.s32.totalorder (!%p2167_p4), %s2157_s9, 0 }
  0xa3   : > { %261 = sbr.rel (%p2167_p4) target bundleno = 490 (0x1ea), region = 36  ;;  %s1965_s30 = sshll.u32 (!%p2167_p4), %s263_s14, 3 }
  0xa4   : > { %s264_s13 = scalar_lea.sflag (!%p2167_p4), [#allocation3], %s263_s14  ;;  %s267_s8 = scalar_lea.vmem (!%p2167_p4), [#allocation2], %s1965_s30 }
  0xaa   : > { %1572 = dma.done.wait (%p2168_p12), %s264_s13, 128  }
  0xab   : > { %1574 = vsyncadd (%p2168_p12), %s264_s13, 4294967168  ;;  %s272_s10 = sand.u32 1, %s1714_s25   ;;  %s274_s12 = sand.u32 1, %s1609_s19  }
  0xac   : > { %s1976_s27 = sshll.u32 %s274_s12, 6  ;;  %s273_s21 = scalar_lea.sflag [#allocation6], %s272_s10 }
  0xad   : > { %s1979_s1 = scalar_lea.vmem [#allocation5], %s1976_s27  ;;  %p2169_p13 = scmp.ne.s32.totalorder %s2143_s6, 0 }
  0xaf   : > { %1576 = dma.done.wait (%p2169_p13), %s273_s21, 1024  }
  0xb0   : > { %1578 = vsyncadd (%p2169_p13), %s273_s21, 4294966272  ;;  %s283_s9 = sand.u32 1, %s1597_s16  }
  0xb1   : > { %s1986_s20 = sshll.u32 %s283_s9, 3 }
  0xb2   : > { %s285_s5 = scalar_lea.vmem [#allocation7], %s1986_s20 }
  0xb3   : > { %1580 = dma.done.wait (%p1916_p9), %s273_s21, 128  }
  0xb4   : > { %1582 = vsyncadd (%p1916_p9), %s273_s21, 4294967168  ;;  %p2170_p3 = scmp.eq.s32.totalorder %s1714_s25, 0 }
  0xb6   : > { %1584 = dma.done.wait (%p2170_p3), [#allocation9], 8192   ;;  %p2171_p7 = pmov %p2170_p3 }
  0xb7   : > { %v1289_v0 = vld [vmem:[#allocation8 + $0x4] ss:$8 sps:$4 sm:$0xff]   ;;  %v1293_v2 = vld [vmem:[#allocation8] ss:$8 sps:$4 sm:$0xff]   ;;  %v1295_v4 = vld [vmem:[#allocation8 + $0x14] ss:$8 sps:$4 sm:$0xff]  }
  0xb8   : > { %1586 = vsyncadd (%p2171_p7), [#allocation9], 4294959104  ;;  %v1291_v1 = vld [vmem:[#allocation8 + $0x104] ss:$8 sps:$4 sm:$0xff]   ;;  %797 = vmatprep.subr.bf16.mxu1 %v1289_v0  ;;  %v1294_v3 = vld [vmem:[#allocation8 + $0x100] ss:$8 sps:$4 sm:$0xff]  }
  0xb9   : > { %850 = vmatprep.subr.bf16.mxu0 %v1291_v1  ;;  %798 = vmatpush1.bf16.msra.mxu1 %v1293_v2  ;;  %v1297_v5 = vld [vmem:[#allocation8 + $0x114] ss:$8 sps:$4 sm:$0xff]   ;;  %v1299_v6 = vld [vmem:[#allocation8 + $0x10] ss:$8 sps:$4 sm:$0xff]   ;;  %v1301_v8 = vld [vmem:[#allocation8 + $0x24] ss:$8 sps:$4 sm:$0xff]  }
  0xba   : > { %851 = vmatpush1.bf16.msra.mxu0 %v1294_v3  ;;  %799 = vmatprep.subr.bf16.mxu1 %v1295_v4  ;;  %v1300_v7 = vld [vmem:[#allocation8 + $0x110] ss:$8 sps:$4 sm:$0xff]   ;;  %v1303_v9 = vld [vmem:[#allocation8 + $0x124] ss:$8 sps:$4 sm:$0xff]   ;;  %v1305_v10 = vld [vmem:[#allocation8 + $0x20] ss:$8 sps:$4 sm:$0xff]  }
  0xbb   : > { %852 = vmatprep.subr.bf16.mxu0 %v1297_v5  ;;  %v1306_v11 = vld [vmem:[#allocation8 + $0x120] ss:$8 sps:$4 sm:$0xff]   ;;  %v1307_v12 = vld [vmem:[#allocation8 + $0x34] ss:$8 sps:$4 sm:$0xff]   ;;  %v1311_v14 = vld [vmem:[#allocation8 + $0x30] ss:$8 sps:$4 sm:$0xff]  }
  0xbc   : > { %v1309_v13 = vld [vmem:[#allocation8 + $0x134] ss:$8 sps:$4 sm:$0xff]   ;;  %v1312_v15 = vld [vmem:[#allocation8 + $0x130] ss:$8 sps:$4 sm:$0xff]   ;;  %v1313_v16 = vld [vmem:[#allocation8 + $0x44] ss:$8 sps:$4 sm:$0xff]  }
  0xbd   : > { %800 = vmatpush1.bf16.msra.mxu1 %v1299_v6  ;;  %v1315_v17 = vld [vmem:[#allocation8 + $0x144] ss:$8 sps:$4 sm:$0xff]   ;;  %v1317_v18 = vld [vmem:[#allocation8 + $0x40] ss:$8 sps:$4 sm:$0xff]   ;;  %v1319_v20 = vld [vmem:[#allocation8 + $0x54] ss:$8 sps:$4 sm:$0xff]  }
  0xbe   : > { %853 = vmatpush1.bf16.msra.mxu0 %v1300_v7  ;;  %801 = vmatprep.subr.bf16.mxu1 %v1301_v8  ;;  %v1318_v19 = vld [vmem:[#allocation8 + $0x140] ss:$8 sps:$4 sm:$0xff]   ;;  %v1321_v21 = vld [vmem:[#allocation8 + $0x154] ss:$8 sps:$4 sm:$0xff]   ;;  %v1323_v22 = vld [vmem:[#allocation8 + $0x50] ss:$8 sps:$4 sm:$0xff]  }
  0xbf   : > { %854 = vmatprep.subr.bf16.mxu0 %v1303_v9  ;;  %v1324_v23 = vld [vmem:[#allocation8 + $0x150] ss:$8 sps:$4 sm:$0xff]   ;;  %v1325_v24 = vld [vmem:[#allocation8 + $0x64] ss:$8 sps:$4 sm:$0xff]   ;;  %v1329_v26 = vld [vmem:[#allocation8 + $0x60] ss:$8 sps:$4 sm:$0xff]  }
  0xc0   : > { %v1327_v25 = vld [vmem:[#allocation8 + $0x164] ss:$8 sps:$4 sm:$0xff]   ;;  %v1330_v27 = vld [vmem:[#allocation8 + $0x160] ss:$8 sps:$4 sm:$0xff]   ;;  %v1331_v28 = vld [vmem:[#allocation8 + $0x74] ss:$8 sps:$4 sm:$0xff]  }
  0xc1   : > { %802 = vmatpush1.bf16.msra.mxu1 %v1305_v10  ;;  %v1333_v29 = vld [vmem:[#allocation8 + $0x174] ss:$8 sps:$4 sm:$0xff]   ;;  %v1335_v30 = vld [vmem:[#allocation8 + $0x70] ss:$8 sps:$4 sm:$0xff]   ;;  %v1337_v32 = vld [vmem:[#allocation8 + $0x84] ss:$8 sps:$4 sm:$0xff]  }
  0xc2   : > { %855 = vmatpush1.bf16.msra.mxu0 %v1306_v11  ;;  %803 = vmatprep.subr.bf16.mxu1 %v1307_v12  ;;  %v1336_v31 = vld [vmem:[#allocation8 + $0x170] ss:$8 sps:$4 sm:$0xff]   ;;  %v1339_v33 = vld [vmem:[#allocation8 + $0x184] ss:$8 sps:$4 sm:$0xff]   ;;  %v1341_v34 = vld [vmem:[#allocation8 + $0x80] ss:$8 sps:$4 sm:$0xff]  }
  0xc3   : > { %856 = vmatprep.subr.bf16.mxu0 %v1309_v13  ;;  %v1342_v35 = vld [vmem:[#allocation8 + $0x180] ss:$8 sps:$4 sm:$0xff]   ;;  %v1343_v36 = vld [vmem:[#allocation8 + $0x94] ss:$8 sps:$4 sm:$0xff]   ;;  %v1347_v38 = vld [vmem:[#allocation8 + $0x90] ss:$8 sps:$4 sm:$0xff]  }
  0xc4   : > { %v1345_v37 = vld [vmem:[#allocation8 + $0x194] ss:$8 sps:$4 sm:$0xff]   ;;  %v1348_v39 = vld [vmem:[#allocation8 + $0x190] ss:$8 sps:$4 sm:$0xff]   ;;  %v1349_v40 = vld [vmem:[#allocation8 + $0xa4] ss:$8 sps:$4 sm:$0xff]  }
  0xc5   : > { %804 = vmatpush1.bf16.msra.mxu1 %v1311_v14  ;;  %v1351_v41 = vld [vmem:[#allocation8 + $0x1a4] ss:$8 sps:$4 sm:$0xff]   ;;  %p337_p9 = scmp.lt.s32.totalorder %s1714_s25, 3  ;;  %v1353_v42 = vld [vmem:[#allocation8 + $0xa0] ss:$8 sps:$4 sm:$0xff]   ;;  %p334_p11 = scmp.gt.s32.totalorder %s1714_s25, 0 }
  0xc6   : > { %857 = vmatpush1.bf16.msra.mxu0 %v1312_v15  ;;  %805 = vmatprep.subr.bf16.mxu1 %v1313_v16  ;;  %v1354_v43 = vld [vmem:[#allocation8 + $0x1a0] ss:$8 sps:$4 sm:$0xff]   ;;  %v1355_v44 = vld [vmem:[#allocation8 + $0xb4] ss:$8 sps:$4 sm:$0xff]   ;;  %v1359_v49 = vld [vmem:[#allocation8 + $0xb0] ss:$8 sps:$4 sm:$0xff]  }
  0xc7   : > { %858 = vmatprep.subr.bf16.mxu0 %v1315_v17  ;;  %v1357_v45 = vld [vmem:[#allocation8 + $0x1b4] ss:$8 sps:$4 sm:$0xff]   ;;  %s2002_s6 = scalar_select %p337_p9, 1, 0  ;;  %v2005_v47 = vld [vmem:[%s1979_s1 + $0x10] sm:$0xff]  ;;  %vm380_vm0 = vcmask 1043456  }
  0xc8   : > { %v2000_v46 = vld [vmem:[%s1979_s1] sm:$0xff]  ;;  %v358_v52 = vpack.c.bf16 %v2005_v47, %v2005_v47  ;;  %v1361_v54 = vld [vmem:[#allocation8 + $0xc4] ss:$8 sps:$4 sm:$0xff]   ;;  %s335_s29 = scalar_select %p334_p11, 1, 0  ;;  %v349_v8 = vld [vmem:[%s1979_s1 + $0x8] sm:$0xff] }
  0xc9   : > { %806 = vmatpush1.bf16.msra.mxu1 %v1317_v18  ;;  %v2008_v48 = vld [vmem:[%s1979_s1 + $0x20] sm:$0xff]  ;;  %v356_v51 = vpack.c.bf16 %v2000_v46, %v2000_v46  ;;  %v1363_v55 = vld [vmem:[#allocation8 + $0x1c4] ss:$8 sps:$4 sm:$0xff]   ;;  %s339_s3 = scvt.s32.f32 %s2002_s6  ;;  %v1365_v58 = vld [vmem:[#allocation8 + $0xc0] ss:$8 sps:$4 sm:$0xff]   ;;  %v357_v15 = vpack.c.bf16 %v349_v8, %v349_v8  ;;  %s323_s11 = scalar_lea.vmem [#allocation10], %s1976_s27 }
  0xca   : > { %859 = vmatpush1.bf16.msra.mxu0 %v1318_v19  ;;  %807 = vmatprep.subr.bf16.mxu1 %v1319_v20  ;;  %v1360_v50 = vld [vmem:[#allocation8 + $0x1b0] ss:$8 sps:$4 sm:$0xff]   ;;  %v2016_v53 = vpack.c.bf16 %v2008_v48, %v2008_v48  ;;  %v369_v56 = vrot.slane %v358_v52, 4  ;;  %v1366_v59 = vld [vmem:[#allocation8 + $0x1c0] ss:$8 sps:$4 sm:$0xff]   ;;  %s336_s15 = scvt.s32.f32 %s335_s29  ;;  %s1161_s14 = sshll.u32 %s1714_s25, 10 }
  0xcb   : > { %860 = vmatprep.subr.bf16.mxu0 %v1321_v21  ;;  %v1367_v62 = vld [vmem:[#allocation8 + $0xd4] ss:$8 sps:$4 sm:$0xff]   ;;  %v345_v1 = vstv %s339_s3  ;;  %v1371_v2 = vld [vmem:[#allocation8 + $0xd0] ss:$8 sps:$4 sm:$0xff]   ;;  %v1373_v4 = vld [vmem:[#allocation8 + $0xe4] ss:$8 sps:$4 sm:$0xff]   ;;  %s2058_s10 = scalar_lea.hbm %s2124_s4, %s1161_s14 }
  0xcc   : > { %v371_v57 = vrot.slane %v2016_v53, 4  ;;  %v387_v60 = vsel %vm380_vm0, %v356_v51, %v369_v56  ;;  %v1369_v63 = vld [vmem:[#allocation8 + $0x1d4] ss:$8 sps:$4 sm:$0xff]   ;;  %v1372_v3 = vld [vmem:[#allocation8 + $0x1d0] ss:$8 sps:$4 sm:$0xff]   ;;  %v340_v6 = vld [vmem:[%s267_s8] sm:$0xff]  ;;  %v341_v7 = vstv %s336_s15 }
  0xcd   : > { %808 = vmatpush1.bf16.msra.mxu1 %v1323_v22  ;;  %829 = vmatprep.mubr.bf16.mxu1 %v387_v60  ;;  %v344_v0 = vld [vmem:[%s285_s5] sm:$0xff]  ;;  %v1375_v5 = vld [vmem:[#allocation8 + $0x1e4] ss:$8 sps:$4 sm:$0xff]   ;;  %v1377_v12 = vld [vmem:[#allocation8 + $0xe0] ss:$8 sps:$4 sm:$0xff]   ;;  %v342_v14 = vmul.f32 %v341_v7, %v340_v6  ;;  %s934_s30 = sshll.u32 %s323_s11, 4  ;;  %s2060_s30 = int_to_ptr.vmem [resolvable:$true] %s934_s30 }
  0xce   : > { %861 = vmatpush1.bf16.msra.mxu0 %v1324_v23  ;;  %809 = vmatprep.subr.bf16.mxu1 %v1325_v24  ;;  %v395_v61 = vsel %vm380_vm0, %v358_v52, %v371_v57  ;;  %v2030_v9 = vld [vmem:[%s1979_s1 + $0x18] sm:$0xff]  ;;  %v346_v10 = vmul.f32 %v345_v1, %v344_v0  ;;  %v2033_v11 = vld [vmem:[%s1979_s1 + $0x30] sm:$0xff]  ;;  %v1379_v17 = vld [vmem:[#allocation8 + $0xf4] ss:$8 sps:$4 sm:$0xff]   ;;  %v368_v24 = vrot.slane %v357_v15, 4  ;;  %s920_s25 = scalar_lea.sflag [#allocation4], %s274_s12 }
  0xcf   : > { %862 = vmatprep.subr.bf16.mxu0 %v1327_v25  ;;  %882 = vmatprep.mubr.bf16.mxu0 %v395_v61  ;;  %v1378_v13 = vld [vmem:[#allocation8 + $0x1e0] ss:$8 sps:$4 sm:$0xff]   ;;  %v359_v16 = vpack.c.bf16 %v2030_v9, %v2030_v9  ;;  %v1381_v18 = vld [vmem:[#allocation8 + $0x1f4] ss:$8 sps:$4 sm:$0xff]   ;;  %v362_v19 = vpack.c.bf16 %v2033_v11, %v2033_v11  ;;  %v1383_v21 = vld [vmem:[#allocation8 + $0xf0] ss:$8 sps:$4 sm:$0xff]   ;;  %v343_v23 = vpack.c.bf16 %v342_v14, %v342_v14 }
  0xd0   : > { %v347_v20 = vpack.c.bf16 %v346_v10, %v346_v10  ;;  %v1384_v22 = vld [vmem:[#allocation8 + $0x1f0] ss:$8 sps:$4 sm:$0xff]   ;;  %s1503_s27 = scalar_lea.vmem %s2060_s30, 1024  ;;  %p2172_p0 = scmp.ne.s32.totalorder %s2144_s7, 0 }
  0xd1   : > { %810 = vmatpush1.bf16.msra.mxu1 %v1329_v26  ;;  %v370_v25 = vrot.slane %v359_v16, 4  ;;  %v353_v26 = vld [vmem:[%s1979_s1 + $0x28] sm:$0xff]  ;;  %p1504_p1 = scmp.ne.s32.totalorder %s2060_s30, %s1503_s27  ;;  %s1637_s21 = smov [#allocation10]  }
  0xd2   : > { %863 = vmatpush1.bf16.msra.mxu0 %v1330_v27  ;;  %811 = vmatprep.subr.bf16.mxu1 %v1331_v28  ;;  %v377_v27 = vrot.slane %v362_v19, 4  ;;  %v379_v28 = vrot.slane %v347_v20, 4 }
  0xd3   : > { %864 = vmatprep.subr.bf16.mxu0 %v1333_v29  ;;  %v355_v29 = vld [vmem:[%s1979_s1 + $0x38] sm:$0xff]  ;;  %p1505_p6 = pnand %p1504_p1, %p2172_p0  ;;  %s1507_s1 = sshll.u32 %s1637_s21, 4  ;;  %s1508_s1 = int_to_ptr.vmem [resolvable:$false] %s1507_s1 }
  0xd4   : > { %s1509_s9 = scalar_lea.vmem %s1508_s1, 2048  ;;  %p1510_p5 = scmp.lt.s32.totalorder %s2060_s30, %s1508_s1 }
  0xd5   : > { %812 = vmatpush1.bf16.msra.mxu1 %v1335_v30  ;;  %v361_v30 = vpack.c.bf16 %v353_v26, %v353_v26  ;;  %p1506_p8 = pneg %p1505_p6  ;;  %p1511_p10 = scmp.lt.s32.totalorder %s1509_s9, %s1503_s27 }
  0xd6   : > { %865 = vmatpush1.bf16.msra.mxu0 %v1336_v31  ;;  %813 = vmatprep.subr.bf16.mxu1 %v1337_v32  ;;  %v383_v31 = vsel %vm380_vm0, %v343_v23, %v368_v24  ;;  %v391_v32 = vsel %vm380_vm0, %v357_v15, %v370_v25 }
  0xd7   : > { %866 = vmatprep.subr.bf16.mxu0 %v1339_v33  ;;  %v363_v33 = vpack.c.bf16 %v355_v29, %v355_v29  ;;  %p1512_p2 = por %p1511_p10, %p1510_p5 }
  0xd9   : > { %814 = vmatpush1.bf16.msra.mxu1 %v1341_v34  ;;  %v403_v34 = vsel %vm380_vm0, %v2016_v53, %v377_v27  ;;  %p1513_p4 = pnand %p1512_p2, %p1506_p8 }
  0xda   : > { %867 = vmatpush1.bf16.msra.mxu0 %v1342_v35  ;;  %815 = vmatprep.subr.bf16.mxu1 %v1343_v36  ;;  %v411_v35 = vsel %vm380_vm0, %v362_v19, %v379_v28  ;;  %v376_v36 = vrot.slane %v361_v30, 4 }
  0xdb   : > { %868 = vmatprep.subr.bf16.mxu0 %v1345_v37  ;;  %v378_v37 = vrot.slane %v363_v33, 4 }
  0xdd   : > { %816 = vmatpush1.bf16.msra.mxu1 %v1347_v38  ;;  %v399_v38 = vsel %vm380_vm0, %v359_v16, %v376_v36 }
  0xde   : > { %869 = vmatpush1.bf16.msra.mxu0 %v1348_v39  ;;  %817 = vmatprep.subr.bf16.mxu1 %v1349_v40  ;;  %v407_v39 = vsel %vm380_vm0, %v361_v30, %v378_v37 }
  0xdf   : > { %870 = vmatprep.subr.bf16.mxu0 %v1351_v41 }
  0xe1   : > { %818 = vmatpush1.bf16.msra.mxu1 %v1353_v42 }
  0xe2   : > { %871 = vmatpush1.bf16.msra.mxu0 %v1354_v43  ;;  %819 = vmatprep.subr.bf16.mxu1 %v1355_v44 }
  0xe3   : > { %872 = vmatprep.subr.bf16.mxu0 %v1357_v45 }
  0xe5   : > { %820 = vmatpush1.bf16.msra.mxu1 %v1359_v49 }
  0xe6   : > { %873 = vmatpush1.bf16.msra.mxu0 %v1360_v50  ;;  %821 = vmatprep.subr.bf16.mxu1 %v1361_v54 }
  0xe7   : > { %874 = vmatprep.subr.bf16.mxu0 %v1363_v55 }
  0xe9   : > { %822 = vmatpush1.bf16.msra.mxu1 %v1365_v58 }
  0xea   : > { %875 = vmatpush1.bf16.msra.mxu0 %v1366_v59  ;;  %823 = vmatprep.subr.bf16.mxu1 %v1367_v62 }
  0xeb   : > { %876 = vmatprep.subr.bf16.mxu0 %v1369_v63 }
  0xed   : > { %824 = vmatpush1.bf16.msra.mxu1 %v1371_v2 }
  0xee   : > { %877 = vmatpush1.bf16.msra.mxu0 %v1372_v3  ;;  %825 = vmatprep.subr.bf16.mxu1 %v1373_v4 }
  0xef   : > { %878 = vmatprep.subr.bf16.mxu0 %v1375_v5 }
  0xf1   : > { %826 = vmatpush1.bf16.msra.mxu1 %v1377_v12 }
  0xf2   : > { %879 = vmatpush1.bf16.msra.mxu0 %v1378_v13  ;;  %827 = vmatprep.subr.bf16.mxu1 %v1379_v17 }
  0xf3   : > { %880 = vmatprep.subr.bf16.mxu0 %v1381_v18 }
  0xf5   : > { %828 = vmatpush1.bf16.msra.mxu1 %v1383_v21 }
  0xf6   : > { %881 = vmatpush1.bf16.msra.mxu0 %v1384_v22 }
  0xf8   : > { %830 = vmatmul.mubr.bf16.vlgmr.msra.gmra.mrb[0].mxu1 %v383_v31 }
  0xf9   : > { %883 = vmatmul.mubr.bf16.vlgmr.msra.gmra.mrb[0].mxu0 %v391_v32  ;;  %839 = vmatprep.mubr.bf16.mxu1 %v403_v34 }
  0xfa   : > { %892 = vmatprep.mubr.bf16.mxu0 %v411_v35 }
 0x100   : > { %840 = vmatmul.mubr.bf16.gmra.mrb[4].mxu1 %v399_v38 }
 0x101   : > { %893 = vmatmul.mubr.bf16.gmra.mrb[4].mxu0 %v407_v39 }
 0x1cb   : > { %v831_v40 = vpop.f32.mrb[0].mxu1 }
 0x1cc   : > { %v884_v41 = vpop.f32.mrb[0].mxu0  ;;  %v833_v43 = vpop.f32.mrb[1].mxu1 }
 0x1cd   : > { %v885_v42 = vadd.f32 %v884_v41, %v831_v40  ;;  %v886_v44 = vpop.f32.mrb[1].mxu0  ;;  %v835_v49 = vpop.f32.mrb[2].mxu1 }
 0x1ce   : > { %v887_v45 = vadd.f32 %v886_v44, %v833_v43  ;;  %v888_v50 = vpop.f32.mrb[2].mxu0  ;;  %v837_v53 = vpop.f32.mrb[3].mxu1 }
 0x1cf   : > { %v903_v51 = vadd.f32 %v885_v42, %v2000_v46  ;;  %v889_v52 = vadd.f32 %v888_v50, %v835_v49  ;;  %v890_v54 = vpop.f32.mrb[3].mxu0 }
 0x1d0   : > { %v904_v55 = vadd.f32 %v887_v45, %v349_v8  ;;  %v891_v56 = vadd.f32 %v890_v54, %v837_v53 }
 0x1d1   : > { %905 = vst [vmem:[%s323_s11] sm:$0xff] %v903_v51  ;;  %v907_v57 = vadd.f32 %v889_v52, %v2005_v47 }
 0x1d2   : > { %906 = vst [vmem:[%s323_s11 + $0x8] sm:$0xff] %v904_v55  ;;  %v908_v58 = vadd.f32 %v891_v56, %v2030_v9 }
 0x1d3   : > { %909 = vst [vmem:[%s323_s11 + $0x10] sm:$0xff] %v907_v57  ;;  %v841_v59 = vpop.f32.mrb[4].mxu1 }
 0x1d4   : > { %910 = vst [vmem:[%s323_s11 + $0x18] sm:$0xff] %v908_v58  ;;  %v894_v60 = vpop.f32.mrb[4].mxu0  ;;  %v843_v62 = vpop.f32.mrb[5].mxu1 }
 0x1d5   : > { %v895_v61 = vadd.f32 %v894_v60, %v841_v59  ;;  %v896_v46 = vpop.f32.mrb[5].mxu0  ;;  %v845_v0 = vpop.f32.mrb[6].mxu1 }
 0x1d6   : > { %v897_v63 = vadd.f32 %v896_v46, %v843_v62  ;;  %v898_v1 = vpop.f32.mrb[6].mxu0  ;;  %v847_v4 = vpop.f32.mrb[7].mxu1 }
 0x1d7   : > { %v911_v2 = vadd.f32 %v895_v61, %v2008_v48  ;;  %v899_v3 = vadd.f32 %v898_v1, %v845_v0  ;;  %v900_v47 = vpop.f32.mrb[7].mxu0 }
 0x1d8   : > { %v912_v5 = vadd.f32 %v897_v63, %v353_v26  ;;  %v901_v6 = vadd.f32 %v900_v47, %v847_v4 }
 0x1d9   : > { %913 = vst [vmem:[%s323_s11 + $0x20] sm:$0xff] %v911_v2  ;;  %v915_v7 = vadd.f32 %v899_v3, %v2033_v11 }
 0x1da   : > { %914 = vst [vmem:[%s323_s11 + $0x28] sm:$0xff] %v912_v5  ;;  %v916_v8 = vadd.f32 %v901_v6, %v355_v29 }
 0x1db   : > { %917 = vst [vmem:[%s323_s11 + $0x30] sm:$0xff] %v915_v7 }
 0x1dc   : > { %918 = vst [vmem:[%s323_s11 + $0x38] sm:$0xff] %v916_v8 }
 0x1dd   : > { %1516 = shalt.err (!%p1513_p4)
}
 0x1de   : > { %s1517_s12 = scalar_lea.hbm %s2058_s10, 1024  ;;  %s1521_s6 = scalar_lea.hbm %s2124_s4, 4096 }
 0x1df   : > { %p1518_p12 = scmp.ne.s32.totalorder %s2058_s10, %s1517_s12  ;;  %p1522_p7 = scmp.lt.u32.totalorder %s2058_s10, %s2124_s4 }
 0x1e0   : > { %p1523_p9 = scmp.lt.u32.totalorder %s1521_s6, %s1517_s12  ;;  %p1525_p1 = scmp.lt.u32.totalorder %s1517_s12, %s2058_s10 }
 0x1e1   : > { %p1519_p13 = pnand %p1518_p12, %p2172_p0 }
 0x1e2   : > { %p1524_p11 = por %p1523_p9, %p1522_p7 }
 0x1e3   : > { %p1520_p3 = pneg %p1519_p13 }
 0x1e4   : > { %p1526_p6 = por %p1525_p1, %p1524_p11 }
 0x1e6   : > { %p1527_p8 = pnand %p1526_p6, %p1520_p3 }
 0x1e8   : > { %1530 = shalt.err (!%p1527_p8)
}
 0x1e9   : > { %1182 = dma.vmem_to_hbm [thread:$0]  (%p2172_p0), %s2060_s30, 1024, %s2058_s10, %s920_s25  }
 0x1ea PF: > { %s2173_s15 = sld [smem:[#allocation19_spill]]  ;;  %p1205_p5 = scmp.ge.s32.totalorder %s1629_s24, 2 }
 0x1eb   : > { %s946_s11 = sand.u32 1, %s1605_s18  }
 0x1ec   : > { %s947_s14 = scalar_lea.sflag [#allocation4], %s946_s11 }
 0x1f0   : > { %p2174_p10 = scmp.ne.s32.totalorder %s2173_s15, 0 }
 0x1f2   : > { %p1199_p2 = pnand %p1205_p5, %p2174_p10 }
 0x1f4   : > { %1588 = dma.done.wait (!%p1199_p2), %s947_s14, 1024  }
 0x1f5   : > { %1590 = vsyncadd (!%p1199_p2), %s947_s14, 4294966272  ;;  %s2175_s24 = sld [smem:[#allocation17_spill]]  ;;  %s2176_s7 = sld [smem:[#allocation16_spill]] }
 0x1f6   : > { %s2177_s20 = sld [smem:[#allocation18_spill]]  ;;  %s2178_s15 = smov %s1597_s16 }
 0x1f7   : > { %s2179_s16 = smov %s1601_s17  ;;  %s2180_s17 = smov %s1921_s26 }
 0x1f8   : > { %s2181_s18 = smov %s1609_s19  ;;  %s2183_s21 = smov %s1621_s22 }
 0x1f9   : > { %s2184_s22 = smov %s1625_s23  ;;  %s2185_s23 = smov %s1859_s28 }
 0x1fb   : > { %p21_p0 = scmp.ge.s32.totalorder %s2175_s24, 6   ;;  %s2182_s19 = smov %s2176_s7 }
 0x1fd   :  { %23 = sbr.rel (!%p21_p0) target bundleno = 14 (0xe), region = 109 }
 0x204   :  { %952 = vsyncpa [#allocation3], 1 }
 0x205   :  { %954 = vsyncpa [#allocation3 + $0x1], 1 }
 0x206   :  { %955 = vsyncpa [#allocation6], 1 }
 0x207   :  { %957 = vsyncpa [#allocation6 + $0x1], 1 }
 0x208   :  { %958 = vsyncpa [#allocation9], 1 }
 0x209   :  { %959 = vsyncpa [#allocation4], 1 }
 0x20a   :  { %961 = vsyncpa [#allocation4 + $0x1], 1 }

</bundles_post_ra>
